<compile_context>
chip_gen: v6e
topology: v6e:2x2x1
jax: 0.10.0
libtpu: 0.0.40
codegen_flags: <defaults>
</compile_context>

<pallas_src>
import functools

import jax
import jax.numpy as jnp
from jax import lax
from jax.experimental import pallas as pl
from jax.experimental.pallas import tpu as pltpu


# ----------------------------- Pallas kernels --------------------------------

def _gemm_bias_act_kernel(x_ref, w_ref, b_ref, o_ref, *, relu):
    """out = act(x @ w + b) for one row-tile of x."""
    acc = jnp.dot(x_ref[...], w_ref[...], preferred_element_type=jnp.float32)
    acc = acc + b_ref[...]
    if relu:
        acc = jnp.maximum(acc, 0.0)
    o_ref[...] = acc.astype(o_ref.dtype)


def _head_kernel(f_ref, w3_ref, b3_ref, wa_ref, ba_ref, wc_ref, bc_ref,
                 logp_ref, val_ref):
    """feature Linear + ReLU, actor logits -> log-softmax, critic value."""
    h = jnp.dot(f_ref[...], w3_ref[...], preferred_element_type=jnp.float32)
    h = jnp.maximum(h + b3_ref[...], 0.0)

    logits = jnp.dot(h, wa_ref[...], preferred_element_type=jnp.float32)
    logits = logits + ba_ref[...]
    m = jnp.max(logits, axis=-1, keepdims=True)
    lse = m + jnp.log(jnp.sum(jnp.exp(logits - m), axis=-1, keepdims=True))
    logp_ref[...] = (logits - lse).astype(logp_ref.dtype)   # Categorical log-probs

    val = jnp.dot(h, wc_ref[...], preferred_element_type=jnp.float32)
    val_ref[...] = (val + bc_ref[...]).astype(val_ref.dtype)


# ------------------------------ Pallas wrappers -------------------------------

_VMEM_LIMIT = 32 * 1024 * 1024


def _pick_block_m(m, target=1024):
    """Largest row tile <= target that divides M and is a multiple of 8."""
    if m <= target:
        return m
    for bm in range(target, 7, -1):
        if m % bm == 0 and bm % 8 == 0:
            return bm
    return m


def matmul_bias_act(x, w, b, *, relu):
    """act(x @ w + b); x:(M,K) f32, w:(K,N), b:(1,N)."""
    m, k = x.shape
    _, n = w.shape
    bm = _pick_block_m(m)
    kern = functools.partial(_gemm_bias_act_kernel, relu=relu)
    return pl.pallas_call(
        kern,
        out_shape=jax.ShapeDtypeStruct((m, n), jnp.float32),
        grid=(m // bm,),
        in_specs=[
            pl.BlockSpec((bm, k), lambda i: (i, 0)),    # row tile of patches
            pl.BlockSpec((k, n), lambda i: (0, 0)),     # weights, VMEM-resident
            pl.BlockSpec((1, n), lambda i: (0, 0)),     # bias
        ],
        out_specs=pl.BlockSpec((bm, n), lambda i: (i, 0)),
        compiler_params=pltpu.CompilerParams(
            dimension_semantics=("parallel",),
            vmem_limit_bytes=_VMEM_LIMIT),
    )(x, w, b)


def head_forward(flat, w3, b3, wa, ba, wc, bc):
    """Fused feature-Linear/ReLU + actor log-softmax + critic value."""
    bsz, kin = flat.shape
    hid = w3.shape[1]
    nact = wa.shape[1]

    def full(shape):
        return pl.BlockSpec(shape, lambda i, _s=shape: (0,) * len(_s))

    return pl.pallas_call(
        _head_kernel,
        out_shape=[jax.ShapeDtypeStruct((bsz, nact), jnp.float32),
                   jax.ShapeDtypeStruct((bsz, 1), jnp.float32)],
        grid=(1,),
        in_specs=[full((bsz, kin)), full((kin, hid)), full((1, hid)),
                  full((hid, nact)), full((1, nact)),
                  full((hid, 1)), full((1, 1))],
        out_specs=[full((bsz, nact)), full((bsz, 1))],
        compiler_params=pltpu.CompilerParams(
            dimension_semantics=("arbitrary",),
            vmem_limit_bytes=_VMEM_LIMIT),
    )(flat, w3, b3, wa, ba, wc, bc)


# ------------------------ im2col (data movement only) -------------------------

def _extract_patches_3d(x, ksize, strides, padding):
    """x: (B, C, D, H, W) -> (B, Do*Ho*Wo, C*kd*kh*kw), plus (Do, Ho, Wo).

    Feature ordering is channel-major then (kd, kh, kw), matching
    torch Conv3d weight.reshape(Cout, -1).
    """
    b, c, d, h, w = x.shape
    kd, kh, kw = ksize
    sd, sh, sw = strides
    pd, ph, pw = padding
    xp = jnp.pad(x, ((0, 0), (0, 0), (pd, pd), (ph, ph), (pw, pw)))
    do = (d + 2 * pd - kd) // sd + 1
    ho = (h + 2 * ph - kh) // sh + 1
    wo = (w + 2 * pw - kw) // sw + 1
    cols = []
    for dk in range(kd):
        for hk in range(kh):
            for wk in range(kw):
                cols.append(xp[:, :,
                               dk:dk + sd * (do - 1) + 1:sd,
                               hk:hk + sh * (ho - 1) + 1:sh,
                               wk:wk + sw * (wo - 1) + 1:sw])
    p = jnp.stack(cols, axis=2)                       # (B, C, K, Do, Ho, Wo)
    p = p.reshape(b, c * kd * kh * kw, do, ho, wo)    # channel-major features
    p = p.transpose(0, 2, 3, 4, 1).reshape(b, do * ho * wo, c * kd * kh * kw)
    return p, (do, ho, wo)


# ------------------------------- model forward --------------------------------

def cnn3d_forward(x, params):
    """CNN3dModel.forward.  x: (B, D, 1, H, W) exactly as given to the module.

    Returns (log_probs, value); log_probs are the normalized logits that
    torch.distributions.Categorical(logits=...) would carry.
    """
    # x.permute(0, 2, 1, 3, 4) -> (B, 1, D, H, W)
    x = jnp.transpose(x, (0, 2, 1, 3, 4))
    bsz = x.shape[0]

    # conv1 (1 -> 16, k=(3,8,8), s=(2,4,4), p=(0,2,2)) + ReLU
    w1 = params["conv1_w"]
    w1f = w1.reshape(w1.shape[0], -1).T                      # (192, 16)
    p1, (d1, h1, wd1) = _extract_patches_3d(x, (3, 8, 8), (2, 4, 4), (0, 2, 2))
    y1 = matmul_bias_act(p1.reshape(bsz * d1 * h1 * wd1, -1),
                         w1f, params["conv1_b"], relu=True)
    y1 = y1.reshape(bsz, d1, h1, wd1, w1.shape[0]).transpose(0, 4, 1, 2, 3)

    # conv2 (16 -> 32, k=(3,4,4), s=2, p=(0,1,1)) + ReLU
    w2 = params["conv2_w"]
    w2f = w2.reshape(w2.shape[0], -1).T                      # (768, 32)
    p2, (d2, h2, wd2) = _extract_patches_3d(y1, (3, 4, 4), (2, 2, 2), (0, 1, 1))
    y2 = matmul_bias_act(p2.reshape(bsz * d2 * h2 * wd2, -1),
                         w2f, params["conv2_b"], relu=True)

    # nn.Flatten order: (B, C, D, H, W) -> (B, C*D*H*W)
    flat = (y2.reshape(bsz, d2, h2, wd2, w2.shape[0])
              .transpose(0, 4, 1, 2, 3).reshape(bsz, -1))

    # feature Linear + ReLU + actor/critic heads (fused Pallas kernel)
    # TODO(synk): Categorical sampling/entropy stay host-side; the kernel
    #             returns the distribution's normalized log-probs.
    logp, value = head_forward(flat, params["lin_w"], params["lin_b"],
                               params["actor_w"], params["actor_b"],
                               params["critic_w"], params["critic_b"])
    return logp, value


# ---------------------- pure-JAX reference (for sanity) -----------------------

def ref_forward(x, params):
    x = jnp.transpose(x, (0, 2, 1, 3, 4))
    dn = ("NCDHW", "OIDHW", "NCDHW")
    y = lax.conv_general_dilated(x, params["conv1_w"], (2, 4, 4),
                                 [(0, 0), (2, 2), (2, 2)], dimension_numbers=dn)
    y = jax.nn.relu(y + params["conv1_b"].reshape(1, -1, 1, 1, 1))
    y = lax.conv_general_dilated(y, params["conv2_w"], (2, 2, 2),
                                 [(0, 0), (1, 1), (1, 1)], dimension_numbers=dn)
    y = jax.nn.relu(y + params["conv2_b"].reshape(1, -1, 1, 1, 1))
    f = y.reshape(y.shape[0], -1)
    h = jax.nn.relu(f @ params["lin_w"] + params["lin_b"])
    logits = h @ params["actor_w"] + params["actor_b"]
    return (jax.nn.log_softmax(logits, axis=-1),
            h @ params["critic_w"] + params["critic_b"])


# ------------------------------------ main ------------------------------------

if __name__ == "__main__":
    B = 2
    D0, H0, W0 = 11, 80, 80       # minimal sizes implied by Linear(32*2*10*10)
    hidden_dim = 128
    num_outputs = 6

    key = jax.random.PRNGKey(0)
    ks = jax.random.split(key, 12)
    x = jax.random.normal(ks[0], (B, D0, 1, H0, W0), jnp.float32)

    def rnd(k, shape, fan_in):
        return jax.random.normal(k, shape, jnp.float32) * (fan_in ** -0.5)

    params = dict(
        conv1_w=rnd(ks[1], (16, 1, 3, 8, 8), 1 * 3 * 8 * 8),
        conv1_b=rnd(ks[2], (1, 16), 16),
        conv2_w=rnd(ks[3], (32, 16, 3, 4, 4), 16 * 3 * 4 * 4),
        conv2_b=rnd(ks[4], (1, 32), 32),
        lin_w=rnd(ks[5], (32 * 2 * 10 * 10, hidden_dim), 32 * 2 * 10 * 10),
        lin_b=rnd(ks[6], (1, hidden_dim), hidden_dim),
        actor_w=rnd(ks[7], (hidden_dim, num_outputs), hidden_dim),
        actor_b=rnd(ks[8], (1, num_outputs), hidden_dim),
        critic_w=rnd(ks[9], (hidden_dim, 1), hidden_dim),
        critic_b=rnd(ks[10], (1, 1), hidden_dim),
    )

    logp, value = cnn3d_forward(x, params)
    logp = jax.block_until_ready(logp)
    value = jax.block_until_ready(value)

    logp_ref, value_ref = ref_forward(x, params)
    assert logp.shape == (B, num_outputs)
    assert value.shape == (B, 1)
    assert jnp.allclose(logp, logp_ref, rtol=1e-3, atol=1e-3)
    assert jnp.allclose(value, value_ref, rtol=1e-3, atol=1e-3)
    assert jnp.allclose(jnp.sum(jnp.exp(logp), axis=-1), 1.0, atol=1e-4)

    print("KERNEL_OK")
</pallas_src>

<mosaic_0001>
module attributes {stable_mosaic.version = 11 : i64} {
  func.func @_gemm_bias_act_kernel(%arg0: i32, %arg1: memref<1000x192xf32, #tpu.memory_space<vmem>>, %arg2: memref<192x16xf32, #tpu.memory_space<vmem>>, %arg3: memref<1x16xf32, #tpu.memory_space<vmem>>, %arg4: memref<1000x16xf32, #tpu.memory_space<vmem>>) attributes {dimension_semantics = [#tpu.dimension_semantics<parallel>], iteration_bounds = array<i64: 4>, scalar_prefetch = 0 : i64, scratch_operands = 0 : i64, tpu.core_type = #tpu.core_type<tc>, window_params = [{transform_indices = @transform_0, window_bounds = array<i64: 1000, 192>}, {pipeline_mode = #tpu.pipeline_mode<synchronous>, transform_indices = @transform_1, window_bounds = array<i64: 192, 16>}, {pipeline_mode = #tpu.pipeline_mode<synchronous>, transform_indices = @transform_2, window_bounds = array<i64: 1, 16>}, {transform_indices = @transform_3, window_bounds = array<i64: 1000, 16>}]} {
    %c0 = arith.constant 0 : index
    %c0_0 = arith.constant 0 : index
    %0 = vector.load %arg1[%c0, %c0_0] : memref<1000x192xf32, #tpu.memory_space<vmem>>, vector<1000x192xf32>
    %c0_1 = arith.constant 0 : index
    %c0_2 = arith.constant 0 : index
    %1 = vector.load %arg2[%c0_1, %c0_2] : memref<192x16xf32, #tpu.memory_space<vmem>>, vector<192x16xf32>
    %cst = arith.constant dense<0.000000e+00> : vector<1000x16xf32>
    %2 = tpu.matmul %0, %1, %cst {dimension_numbers = #tpu.dot_dimension_numbers<[1], [0], [0], [1], [0, 0, 1, 1], [], []>} : vector<1000x192xf32>, vector<192x16xf32>, vector<1000x16xf32> -> vector<1000x16xf32>
    %c0_3 = arith.constant 0 : index
    %c0_4 = arith.constant 0 : index
    %3 = vector.load %arg3[%c0_3, %c0_4] : memref<1x16xf32, #tpu.memory_space<vmem>>, vector<1x16xf32>
    %4 = vector.broadcast %3 : vector<1x16xf32> to vector<1000x16xf32>
    %5 = arith.addf %2, %4 : vector<1000x16xf32>
    %cst_5 = arith.constant 0.000000e+00 : f32
    %6 = vector.broadcast %cst_5 : f32 to vector<1000x16xf32>
    %7 = arith.maximumf %5, %6 : vector<1000x16xf32>
    %c0_6 = arith.constant 0 : index
    %c0_7 = arith.constant 0 : index
    %8 = vector.load %arg4[%c0_6, %c0_7] : memref<1000x16xf32, #tpu.memory_space<vmem>>, vector<1000x16xf32>
    tpu.vector_store %arg4[%c0_6, %c0_7], %7 {strides = array<i32>} : memref<1000x16xf32, #tpu.memory_space<vmem>>, vector<1000x16xf32>,
    return
  }
  func.func @transform_0(%arg0: i32) -> (i32, i32) {
    %c0_i32 = arith.constant 0 : i32
    %c0_i32_0 = arith.constant 0 : i32
    return %arg0, %c0_i32 : i32, i32
  }
  func.func @transform_1(%arg0: i32) -> (i32, i32) {
    %c0_i32 = arith.constant 0 : i32
    %c0_i32_0 = arith.constant 0 : i32
    %c0_i32_1 = arith.constant 0 : i32
    return %c0_i32, %c0_i32_0 : i32, i32
  }
  func.func @transform_2(%arg0: i32) -> (i32, i32) {
    %c0_i32 = arith.constant 0 : i32
    %c0_i32_0 = arith.constant 0 : i32
    %c0_i32_1 = arith.constant 0 : i32
    return %c0_i32, %c0_i32_0 : i32, i32
  }
  func.func @transform_3(%arg0: i32) -> (i32, i32) {
    %c0_i32 = arith.constant 0 : i32
    %c0_i32_0 = arith.constant 0 : i32
    return %arg0, %c0_i32 : i32, i32
  }
}

</mosaic_0001>

<bundles_post_ra>
// kernel: tpu_custom_call.1
= control target key start
LH: loop header
LB: loop body
LE: loop exit
PB: predicated region body
PF: predicated region fallthrough
CT: control target
= control target key end

     0   :  { %s2055_s12 = smov 0   ;;  %s2962_s0 = inlined_call_operand.vmem [shape: f32[4000,192], index: 0, kind: input, shape index: {}]   ;;  %s2963_s1 = inlined_call_operand.vmem [shape: f32[192,16], index: 1, kind: input, shape index: {}]   ;;  %s2964_s2 = inlined_call_operand.vmem [shape: f32[1,16], index: 2, kind: input, shape index: {}]   ;;  %s2965_s3 = inlined_call_operand.vmem [shape: f32[4000,16], index: 3, kind: output, shape index: {}]  }
   0x1 LB: > { %s1831_s13 = sadd.s32 4294967295, %s2032_s12   ;;  %p1835_p0 = scmp.ge.s32.totalorder %s2032_s12, 1  ;;  %s2032_s12 = sphi %s2055_s12, %s13_s12  }
   0x2   : > { %p139_p1 = scmp.lt.s32.totalorder %s2032_s12, 5 }
   0x4   : > { %p140_p2 = pnand %p1835_p0, %p139_p1 }
   0x5   : > { %s164_s17 = smul.u32 (!%p140_p2), 125, %s1831_s13 }
   0x6   : > { %143 = sbr.rel (%p140_p2) target bundleno = 506 (0x1fa), region = 32 }
   0x7   : > { %p165_p3 = scmp.lt.s32.totalorder (!%p140_p2), %s164_s17, 499 }
   0xb   : > { %v442_v0 = vld [vmem:[%s2963_s1 + $0x78] sm:$0xff]  ;;  %v2034_v1 = vmov 0.0   ;;  %v441_v2 = vld [vmem:[%s2963_s1 + $0x70] sm:$0xff]  ;;  %v440_v3 = vld [vmem:[%s2963_s1 + $0x68] sm:$0xff]  ;;  %s2967_s17 = smov (!%p165_p3, %s164_s17), 499  ;;  %vm458_vm0 = vcmask 523264  }
   0xc   : > { %834 = vmatprep.subr.mxu0 %v2034_v1  ;;  %1968 = vmatprep.subr.mxu1 %v2034_v1  ;;  %v439_v4 = vld [vmem:[%s2963_s1 + $0x60] sm:$0xff]  ;;  %v438_v5 = vld [vmem:[%s2963_s1 + $0x58] sm:$0xff]  ;;  %v437_v6 = vld [vmem:[%s2963_s1 + $0x50] sm:$0xff]  ;;  %s1967_s29 = sshll.u32 %s2967_s17, 4  ;;  %s1838_s19 = sshll.u32 %s2967_s17, 3  ;;  %vm1649_vm1 = vcmask 130048  }
   0xd   : > { %835 = vmatpush1.msra.mxu0 %v442_v0  ;;  %1992 = vmatpush1.msra.mxu1 %v442_v0  ;;  %v436_v7 = vld [vmem:[%s2963_s1 + $0x48] sm:$0xff]  ;;  %v435_v8 = vld [vmem:[%s2963_s1 + $0x40] sm:$0xff]  ;;  %v434_v9 = vld [vmem:[%s2963_s1 + $0x38] sm:$0xff]  ;;  %s2179_s9 = scalar_lea.vmem %s2962_s0, %s1967_s29  ;;  %s2501_s13 = scalar_lea.vmem %s2965_s3, %s1838_s19 }
   0xe   : > { %836 = vmatprep.subr.mxu0 %v2034_v1  ;;  %1969 = vmatprep.subr.mxu1 %v2034_v1  ;;  %v433_v10 = vld [vmem:[%s2963_s1 + $0x30] sm:$0xff]  ;;  %v432_v11 = vld [vmem:[%s2963_s1 + $0x28] sm:$0xff]  ;;  %v431_v12 = vld [vmem:[%s2963_s1 + $0x20] sm:$0xff] }
   0xf   : > { %837 = vmatpush1.msra.mxu0 %v441_v2  ;;  %1993 = vmatpush1.msra.mxu1 %v441_v2  ;;  %v430_v13 = vld [vmem:[%s2963_s1 + $0x18] sm:$0xff]  ;;  %v429_v14 = vld [vmem:[%s2963_s1 + $0x10] sm:$0xff]  ;;  %v428_v15 = vld [vmem:[%s2963_s1 + $0x8] sm:$0xff] }
  0x10   : > { %838 = vmatprep.subr.mxu0 %v2034_v1  ;;  %1970 = vmatprep.subr.mxu1 %v2034_v1  ;;  %v427_v16 = vld [vmem:[%s2963_s1] sm:$0xff]  ;;  %v450_v17 = vld [vmem:[%s2963_s1 + $0xb8] sm:$0xff]  ;;  %v449_v18 = vld [vmem:[%s2963_s1 + $0xb0] sm:$0xff] }
  0x11   : > { %839 = vmatpush1.msra.mxu0 %v440_v3  ;;  %1994 = vmatpush1.msra.mxu1 %v440_v3  ;;  %v448_v19 = vld [vmem:[%s2963_s1 + $0xa8] sm:$0xff]  ;;  %v447_v20 = vld [vmem:[%s2963_s1 + $0xa0] sm:$0xff]  ;;  %v446_v21 = vld [vmem:[%s2963_s1 + $0x98] sm:$0xff] }
  0x12   : > { %840 = vmatprep.subr.mxu0 %v2034_v1  ;;  %1971 = vmatprep.subr.mxu1 %v2034_v1  ;;  %v445_v22 = vld [vmem:[%s2963_s1 + $0x90] sm:$0xff]  ;;  %v444_v23 = vld [vmem:[%s2963_s1 + $0x88] sm:$0xff]  ;;  %v443_v25 = vld [vmem:[%s2963_s1 + $0x80] sm:$0xff] }
  0x13   : > { %841 = vmatpush1.msra.mxu0 %v439_v4  ;;  %1995 = vmatpush1.msra.mxu1 %v439_v4  ;;  %v178_v24 = vld [vmem:[%s2179_s9 + $0x8] sm:$0xff]  ;;  %v177_v26 = vld [vmem:[%s2179_s9] sm:$0xff]  ;;  %v304_v27 = vld [vmem:[%s2179_s9 + $0x3f8] sm:$0xff] }
  0x14   : > { %842 = vmatprep.subr.mxu0 %v2034_v1  ;;  %1972 = vmatprep.subr.mxu1 %v2034_v1  ;;  %v180_v28 = vld [vmem:[%s2179_s9 + $0x18] sm:$0xff]  ;;  %v303_v29 = vld [vmem:[%s2179_s9 + $0x3f0] sm:$0xff]  ;;  %v306_v30 = vld [vmem:[%s2179_s9 + $0x408] sm:$0xff] }
  0x15   : > { %843 = vmatpush1.msra.mxu0 %v438_v5  ;;  %1996 = vmatpush1.msra.mxu1 %v438_v5  ;;  %v179_v31 = vld [vmem:[%s2179_s9 + $0x10] sm:$0xff]  ;;  %v182_v32 = vld [vmem:[%s2179_s9 + $0x28] sm:$0xff]  ;;  %v305_v33 = vld [vmem:[%s2179_s9 + $0x400] sm:$0xff] }
  0x16   : > { %844 = vmatprep.subr.mxu0 %v2034_v1  ;;  %1973 = vmatprep.subr.mxu1 %v2034_v1  ;;  %v308_v34 = vld [vmem:[%s2179_s9 + $0x418] sm:$0xff]  ;;  %v181_v35 = vld [vmem:[%s2179_s9 + $0x20] sm:$0xff]  ;;  %v307_v37 = vld [vmem:[%s2179_s9 + $0x410] sm:$0xff] }
  0x17   : > { %845 = vmatpush1.msra.mxu0 %v437_v6  ;;  %1997 = vmatpush1.msra.mxu1 %v437_v6  ;;  %v184_v36 = vld [vmem:[%s2179_s9 + $0x38] sm:$0xff]  ;;  %v310_v38 = vld [vmem:[%s2179_s9 + $0x428] sm:$0xff]  ;;  %v183_v39 = vld [vmem:[%s2179_s9 + $0x30] sm:$0xff] }
  0x18   : > { %846 = vmatprep.subr.mxu0 %v2034_v1  ;;  %1974 = vmatprep.subr.mxu1 %v2034_v1  ;;  %v186_v40 = vld [vmem:[%s2179_s9 + $0x48] sm:$0xff]  ;;  %v309_v41 = vld [vmem:[%s2179_s9 + $0x420] sm:$0xff]  ;;  %v312_v42 = vld [vmem:[%s2179_s9 + $0x438] sm:$0xff] }
  0x19   : > { %847 = vmatpush1.msra.mxu0 %v436_v7  ;;  %1998 = vmatpush1.msra.mxu1 %v436_v7  ;;  %v185_v43 = vld [vmem:[%s2179_s9 + $0x40] sm:$0xff]  ;;  %v188_v44 = vld [vmem:[%s2179_s9 + $0x58] sm:$0xff]  ;;  %v311_v45 = vld [vmem:[%s2179_s9 + $0x430] sm:$0xff] }
  0x1a   : > { %848 = vmatprep.subr.mxu0 %v2034_v1  ;;  %1975 = vmatprep.subr.mxu1 %v2034_v1  ;;  %v314_v46 = vld [vmem:[%s2179_s9 + $0x448] sm:$0xff]  ;;  %v187_v47 = vld [vmem:[%s2179_s9 + $0x50] sm:$0xff]  ;;  %v313_v49 = vld [vmem:[%s2179_s9 + $0x440] sm:$0xff] }
  0x1b   : > { %849 = vmatpush1.msra.mxu0 %v435_v8  ;;  %1999 = vmatpush1.msra.mxu1 %v435_v8  ;;  %v190_v48 = vld [vmem:[%s2179_s9 + $0x68] sm:$0xff]  ;;  %v316_v50 = vld [vmem:[%s2179_s9 + $0x458] sm:$0xff]  ;;  %v189_v51 = vld [vmem:[%s2179_s9 + $0x60] sm:$0xff] }
  0x1c   : > { %850 = vmatprep.subr.mxu0 %v2034_v1  ;;  %1976 = vmatprep.subr.mxu1 %v2034_v1  ;;  %v192_v52 = vld [vmem:[%s2179_s9 + $0x78] sm:$0xff]  ;;  %v315_v53 = vld [vmem:[%s2179_s9 + $0x450] sm:$0xff]  ;;  %v318_v54 = vld [vmem:[%s2179_s9 + $0x468] sm:$0xff] }
  0x1d   : > { %851 = vmatpush1.msra.mxu0 %v434_v9  ;;  %2000 = vmatpush1.msra.mxu1 %v434_v9  ;;  %v191_v55 = vld [vmem:[%s2179_s9 + $0x70] sm:$0xff]  ;;  %v194_v56 = vld [vmem:[%s2179_s9 + $0x88] sm:$0xff]  ;;  %v317_v57 = vld [vmem:[%s2179_s9 + $0x460] sm:$0xff] }
  0x1e   : > { %852 = vmatprep.subr.mxu0 %v2034_v1  ;;  %1977 = vmatprep.subr.mxu1 %v2034_v1  ;;  %v320_v58 = vld [vmem:[%s2179_s9 + $0x478] sm:$0xff]  ;;  %v193_v59 = vld [vmem:[%s2179_s9 + $0x80] sm:$0xff]  ;;  %v319_v61 = vld [vmem:[%s2179_s9 + $0x470] sm:$0xff] }
  0x1f   : > { %853 = vmatpush1.msra.mxu0 %v433_v10  ;;  %2001 = vmatpush1.msra.mxu1 %v433_v10  ;;  %v196_v60 = vld [vmem:[%s2179_s9 + $0x98] sm:$0xff]  ;;  %v322_v62 = vld [vmem:[%s2179_s9 + $0x488] sm:$0xff]  ;;  %v195_v63 = vld [vmem:[%s2179_s9 + $0x90] sm:$0xff] }
  0x20   : > { %854 = vmatprep.subr.mxu0 %v2034_v1  ;;  %1978 = vmatprep.subr.mxu1 %v2034_v1  ;;  %v198_v0 = vld [vmem:[%s2179_s9 + $0xa8] sm:$0xff]  ;;  %v324_v2 = vld [vmem:[%s2179_s9 + $0x498] sm:$0xff]  ;;  %v197_v3 = vld [vmem:[%s2179_s9 + $0xa0] sm:$0xff] }
  0x21   : > { %855 = vmatpush1.msra.mxu0 %v432_v11  ;;  %2002 = vmatpush1.msra.mxu1 %v432_v11  ;;  %v200_v4 = vld [vmem:[%s2179_s9 + $0xb8] sm:$0xff]  ;;  %v323_v5 = vld [vmem:[%s2179_s9 + $0x490] sm:$0xff]  ;;  %v326_v6 = vld [vmem:[%s2179_s9 + $0x4a8] sm:$0xff] }
  0x22   : > { %856 = vmatprep.subr.mxu0 %v2034_v1  ;;  %1979 = vmatprep.subr.mxu1 %v2034_v1  ;;  %v199_v7 = vld [vmem:[%s2179_s9 + $0xb0] sm:$0xff]  ;;  %v202_v8 = vld [vmem:[%s2179_s9 + $0xc8] sm:$0xff]  ;;  %v325_v9 = vld [vmem:[%s2179_s9 + $0x4a0] sm:$0xff] }
  0x23   : > { %857 = vmatpush1.msra.mxu0 %v431_v12  ;;  %2003 = vmatpush1.msra.mxu1 %v431_v12  ;;  %v328_v10 = vld [vmem:[%s2179_s9 + $0x4b8] sm:$0xff]  ;;  %v201_v11 = vld [vmem:[%s2179_s9 + $0xc0] sm:$0xff] }
  0x24   : > { %858 = vmatprep.subr.mxu0 %v2034_v1  ;;  %1980 = vmatprep.subr.mxu1 %v2034_v1  ;;  %v204_v12 = vld [vmem:[%s2179_s9 + $0xd8] sm:$0xff] }
  0x25   : > { %859 = vmatpush1.msra.mxu0 %v430_v13  ;;  %2004 = vmatpush1.msra.mxu1 %v430_v13  ;;  %v327_v13 = vld [vmem:[%s2179_s9 + $0x4b0] sm:$0xff] }
  0x26   : > { %860 = vmatprep.subr.mxu0 %v2034_v1  ;;  %1981 = vmatprep.subr.mxu1 %v2034_v1 }
  0x27   : > { %861 = vmatpush1.msra.mxu0 %v429_v14  ;;  %2005 = vmatpush1.msra.mxu1 %v429_v14  ;;  %v330_v14 = vld [vmem:[%s2179_s9 + $0x4c8] sm:$0xff] }
  0x28   : > { %862 = vmatprep.subr.mxu0 %v2034_v1  ;;  %1982 = vmatprep.subr.mxu1 %v2034_v1 }
  0x29   : > { %863 = vmatpush1.msra.mxu0 %v428_v15  ;;  %2006 = vmatpush1.msra.mxu1 %v428_v15  ;;  %v203_v15 = vld [vmem:[%s2179_s9 + $0xd0] sm:$0xff] }
  0x2a   : > { %864 = vmatprep.subr.mxu0 %v2034_v1  ;;  %1983 = vmatprep.subr.mxu1 %v2034_v1 }
  0x2b   : > { %865 = vmatpush1.msra.mxu0 %v427_v16  ;;  %2007 = vmatpush1.msra.mxu1 %v427_v16  ;;  %v206_v16 = vld [vmem:[%s2179_s9 + $0xe8] sm:$0xff] }
  0x2c   : > { %882 = vmatprep.subr.mxu0 %v2034_v1  ;;  %1984 = vmatprep.subr.mxu1 %v2034_v1 }
  0x2d   : > { %883 = vmatpush2.msra.mxu0 %v450_v17  ;;  %2008 = vmatpush2.msra.mxu1 %v450_v17  ;;  %v329_v17 = vld [vmem:[%s2179_s9 + $0x4c0] sm:$0xff] }
  0x2e   : > { %884 = vmatprep.subr.mxu0 %v2034_v1  ;;  %1985 = vmatprep.subr.mxu1 %v2034_v1 }
  0x2f   : > { %885 = vmatpush2.msra.mxu0 %v449_v18  ;;  %2009 = vmatpush2.msra.mxu1 %v449_v18  ;;  %v332_v18 = vld [vmem:[%s2179_s9 + $0x4d8] sm:$0xff] }
  0x30   : > { %886 = vmatprep.subr.mxu0 %v2034_v1  ;;  %1986 = vmatprep.subr.mxu1 %v2034_v1 }
  0x31   : > { %887 = vmatpush2.msra.mxu0 %v448_v19  ;;  %2010 = vmatpush2.msra.mxu1 %v448_v19  ;;  %v205_v19 = vld [vmem:[%s2179_s9 + $0xe0] sm:$0xff] }
  0x32   : > { %888 = vmatprep.subr.mxu0 %v2034_v1  ;;  %1987 = vmatprep.subr.mxu1 %v2034_v1 }
  0x33   : > { %889 = vmatpush2.msra.mxu0 %v447_v20  ;;  %2011 = vmatpush2.msra.mxu1 %v447_v20  ;;  %v208_v20 = vld [vmem:[%s2179_s9 + $0xf8] sm:$0xff] }
  0x34   : > { %890 = vmatprep.subr.mxu0 %v2034_v1  ;;  %1988 = vmatprep.subr.mxu1 %v2034_v1 }
  0x35   : > { %891 = vmatpush2.msra.mxu0 %v446_v21  ;;  %2012 = vmatpush2.msra.mxu1 %v446_v21  ;;  %v331_v21 = vld [vmem:[%s2179_s9 + $0x4d0] sm:$0xff] }
  0x36   : > { %892 = vmatprep.subr.mxu0 %v2034_v1  ;;  %1989 = vmatprep.subr.mxu1 %v2034_v1 }
  0x37   : > { %893 = vmatpush2.msra.mxu0 %v445_v22  ;;  %2013 = vmatpush2.msra.mxu1 %v445_v22  ;;  %v334_v22 = vld [vmem:[%s2179_s9 + $0x4e8] sm:$0xff] }
  0x38   : > { %894 = vmatprep.subr.mxu0 %v2034_v1  ;;  %1990 = vmatprep.subr.mxu1 %v2034_v1 }
  0x39   : > { %895 = vmatpush2.msra.mxu0 %v444_v23  ;;  %2014 = vmatpush2.msra.mxu1 %v444_v23  ;;  %v207_v23 = vld [vmem:[%s2179_s9 + $0xf0] sm:$0xff] }
  0x3a   : > { %896 = vmatprep.subr.mxu0 %v2034_v1  ;;  %1840 = vmatprep.mubr.msk.f32.mxu0 %vm458_vm0, %v178_v24  ;;  %v210_v24 = vld [vmem:[%s2179_s9 + $0x108] sm:$0xff] }
  0x3b   : > { %897 = vmatpush2.msra.mxu0 %v443_v25  ;;  %1991 = vmatprep.subr.mxu1 %v2034_v1  ;;  %v321_v1 = vld [vmem:[%s2179_s9 + $0x480] sm:$0xff] }
  0x3c   : > { %899 = vmatmul.mubr.f32.vlgmr.msra.gmra.mxu0 %v177_v26  ;;  %2015 = vmatpush2.msra.mxu1 %v443_v25  ;;  %v333_v25 = vld [vmem:[%s2179_s9 + $0x4e0] sm:$0xff]  ;;  %v336_v26 = vld [vmem:[%s2179_s9 + $0x4f8] sm:$0xff] }
  0x3d   : > { %1903 = vmatprep.mubr.msk.f32.mxu1 %vm458_vm0, %v304_v27  ;;  %1841 = vmatprep.mubr.msk.f32.mxu0 %vm458_vm0, %v180_v28  ;;  %v209_v27 = vld [vmem:[%s2179_s9 + $0x100] sm:$0xff]  ;;  %v212_v28 = vld [vmem:[%s2179_s9 + $0x118] sm:$0xff] }
  0x3e   : > { %1214 = vmatmul.mubr.f32.vlgmr.msra.gmra.mxu1 %v303_v29  ;;  %v335_v29 = vld [vmem:[%s2179_s9 + $0x4f0] sm:$0xff] }
  0x3f   : > { %1904 = vmatprep.mubr.msk.f32.mxu1 %vm458_vm0, %v306_v30  ;;  %v338_v30 = vld [vmem:[%s2179_s9 + $0x508] sm:$0xff] }
  0x40   : > { %904 = vmatmul.mubr.f32.gmra.mxu0 %v179_v31  ;;  %v211_v31 = vld [vmem:[%s2179_s9 + $0x110] sm:$0xff] }
  0x41   : > { %1842 = vmatprep.mubr.msk.f32.mxu0 %vm458_vm0, %v182_v32  ;;  %v214_v32 = vld [vmem:[%s2179_s9 + $0x128] sm:$0xff] }
  0x42   : > { %1219 = vmatmul.mubr.f32.gmra.mxu1 %v305_v33  ;;  %v337_v33 = vld [vmem:[%s2179_s9 + $0x500] sm:$0xff] }
  0x43   : > { %1905 = vmatprep.mubr.msk.f32.mxu1 %vm458_vm0, %v308_v34  ;;  %v340_v34 = vld [vmem:[%s2179_s9 + $0x518] sm:$0xff] }
  0x44   : > { %909 = vmatmul.mubr.f32.gmra.mxu0 %v181_v35  ;;  %v213_v35 = vld [vmem:[%s2179_s9 + $0x120] sm:$0xff] }
  0x45   : > { %1843 = vmatprep.mubr.msk.f32.mxu0 %vm458_vm0, %v184_v36  ;;  %v216_v36 = vld [vmem:[%s2179_s9 + $0x138] sm:$0xff] }
  0x46   : > { %1224 = vmatmul.mubr.f32.gmra.mxu1 %v307_v37  ;;  %v339_v37 = vld [vmem:[%s2179_s9 + $0x510] sm:$0xff] }
  0x47   : > { %1906 = vmatprep.mubr.msk.f32.mxu1 %vm458_vm0, %v310_v38  ;;  %v342_v38 = vld [vmem:[%s2179_s9 + $0x528] sm:$0xff] }
  0x48   : > { %914 = vmatmul.mubr.f32.gmra.mxu0 %v183_v39  ;;  %v215_v39 = vld [vmem:[%s2179_s9 + $0x130] sm:$0xff] }
  0x49   : > { %1844 = vmatprep.mubr.msk.f32.mxu0 %vm458_vm0, %v186_v40  ;;  %v218_v40 = vld [vmem:[%s2179_s9 + $0x148] sm:$0xff] }
  0x4a   : > { %1229 = vmatmul.mubr.f32.gmra.mxu1 %v309_v41  ;;  %v341_v41 = vld [vmem:[%s2179_s9 + $0x520] sm:$0xff] }
  0x4b   : > { %1907 = vmatprep.mubr.msk.f32.mxu1 %vm458_vm0, %v312_v42  ;;  %v344_v42 = vld [vmem:[%s2179_s9 + $0x538] sm:$0xff] }
  0x4c   : > { %919 = vmatmul.mubr.f32.gmra.mxu0 %v185_v43  ;;  %v217_v43 = vld [vmem:[%s2179_s9 + $0x140] sm:$0xff] }
  0x4d   : > { %1845 = vmatprep.mubr.msk.f32.mxu0 %vm458_vm0, %v188_v44  ;;  %v220_v44 = vld [vmem:[%s2179_s9 + $0x158] sm:$0xff] }
  0x4e   : > { %1234 = vmatmul.mubr.f32.gmra.mxu1 %v311_v45  ;;  %v343_v45 = vld [vmem:[%s2179_s9 + $0x530] sm:$0xff] }
  0x4f   : > { %1908 = vmatprep.mubr.msk.f32.mxu1 %vm458_vm0, %v314_v46  ;;  %v346_v46 = vld [vmem:[%s2179_s9 + $0x548] sm:$0xff] }
  0x50   : > { %924 = vmatmul.mubr.f32.gmra.mxu0 %v187_v47  ;;  %v219_v47 = vld [vmem:[%s2179_s9 + $0x150] sm:$0xff] }
  0x51   : > { %1846 = vmatprep.mubr.msk.f32.mxu0 %vm458_vm0, %v190_v48  ;;  %v222_v48 = vld [vmem:[%s2179_s9 + $0x168] sm:$0xff] }
  0x52   : > { %1239 = vmatmul.mubr.f32.gmra.mxu1 %v313_v49  ;;  %v345_v49 = vld [vmem:[%s2179_s9 + $0x540] sm:$0xff] }
  0x53   : > { %1909 = vmatprep.mubr.msk.f32.mxu1 %vm458_vm0, %v316_v50  ;;  %v348_v50 = vld [vmem:[%s2179_s9 + $0x558] sm:$0xff] }
  0x54   : > { %929 = vmatmul.mubr.f32.gmra.mxu0 %v189_v51  ;;  %v221_v51 = vld [vmem:[%s2179_s9 + $0x160] sm:$0xff] }
  0x55   : > { %1847 = vmatprep.mubr.msk.f32.mxu0 %vm458_vm0, %v192_v52  ;;  %v224_v52 = vld [vmem:[%s2179_s9 + $0x178] sm:$0xff] }
  0x56   : > { %1244 = vmatmul.mubr.f32.gmra.mxu1 %v315_v53  ;;  %v347_v53 = vld [vmem:[%s2179_s9 + $0x550] sm:$0xff] }
  0x57   : > { %1910 = vmatprep.mubr.msk.f32.mxu1 %vm458_vm0, %v318_v54  ;;  %v350_v54 = vld [vmem:[%s2179_s9 + $0x568] sm:$0xff] }
  0x58   : > { %934 = vmatmul.mubr.f32.gmra.mxu0 %v191_v55  ;;  %v223_v55 = vld [vmem:[%s2179_s9 + $0x170] sm:$0xff] }
  0x59   : > { %1848 = vmatprep.mubr.msk.f32.mxu0 %vm458_vm0, %v194_v56  ;;  %v226_v56 = vld [vmem:[%s2179_s9 + $0x188] sm:$0xff] }
  0x5a   : > { %1249 = vmatmul.mubr.f32.gmra.mxu1 %v317_v57  ;;  %v349_v57 = vld [vmem:[%s2179_s9 + $0x560] sm:$0xff] }
  0x5b   : > { %1911 = vmatprep.mubr.msk.f32.mxu1 %vm458_vm0, %v320_v58  ;;  %v352_v58 = vld [vmem:[%s2179_s9 + $0x578] sm:$0xff] }
  0x5c   : > { %939 = vmatmul.mubr.f32.gmra.mxu0 %v193_v59  ;;  %v225_v59 = vld [vmem:[%s2179_s9 + $0x180] sm:$0xff] }
  0x5d   : > { %1849 = vmatprep.mubr.msk.f32.mxu0 %vm458_vm0, %v196_v60  ;;  %v228_v60 = vld [vmem:[%s2179_s9 + $0x198] sm:$0xff] }
  0x5e   : > { %1254 = vmatmul.mubr.f32.gmra.mxu1 %v319_v61  ;;  %v351_v61 = vld [vmem:[%s2179_s9 + $0x570] sm:$0xff] }
  0x5f   : > { %1912 = vmatprep.mubr.msk.f32.mxu1 %vm458_vm0, %v322_v62  ;;  %v354_v62 = vld [vmem:[%s2179_s9 + $0x588] sm:$0xff] }
  0x60   : > { %944 = vmatmul.mubr.f32.gmra.mxu0 %v195_v63  ;;  %v227_v63 = vld [vmem:[%s2179_s9 + $0x190] sm:$0xff] }
  0x61   : > { %1850 = vmatprep.mubr.msk.f32.mxu0 %vm458_vm0, %v198_v0  ;;  %v230_v0 = vld [vmem:[%s2179_s9 + $0x1a8] sm:$0xff] }
  0x62   : > { %1259 = vmatmul.mubr.f32.gmra.mxu1 %v321_v1  ;;  %v353_v1 = vld [vmem:[%s2179_s9 + $0x580] sm:$0xff] }
  0x63   : > { %1913 = vmatprep.mubr.msk.f32.mxu1 %vm458_vm0, %v324_v2  ;;  %v356_v2 = vld [vmem:[%s2179_s9 + $0x598] sm:$0xff] }
  0x64   : > { %949 = vmatmul.mubr.f32.gmra.mxu0 %v197_v3  ;;  %v229_v3 = vld [vmem:[%s2179_s9 + $0x1a0] sm:$0xff] }
  0x65   : > { %1851 = vmatprep.mubr.msk.f32.mxu0 %vm458_vm0, %v200_v4  ;;  %v232_v4 = vld [vmem:[%s2179_s9 + $0x1b8] sm:$0xff] }
  0x66   : > { %1264 = vmatmul.mubr.f32.gmra.mxu1 %v323_v5  ;;  %v355_v5 = vld [vmem:[%s2179_s9 + $0x590] sm:$0xff] }
  0x67   : > { %1914 = vmatprep.mubr.msk.f32.mxu1 %vm458_vm0, %v326_v6  ;;  %v358_v6 = vld [vmem:[%s2179_s9 + $0x5a8] sm:$0xff] }
  0x68   : > { %954 = vmatmul.mubr.f32.gmra.mxu0 %v199_v7  ;;  %v231_v7 = vld [vmem:[%s2179_s9 + $0x1b0] sm:$0xff] }
  0x69   : > { %1852 = vmatprep.mubr.msk.f32.mxu0 %vm458_vm0, %v202_v8  ;;  %v234_v8 = vld [vmem:[%s2179_s9 + $0x1c8] sm:$0xff] }
  0x6a   : > { %1269 = vmatmul.mubr.f32.gmra.mxu1 %v325_v9  ;;  %v357_v9 = vld [vmem:[%s2179_s9 + $0x5a0] sm:$0xff] }
  0x6b   : > { %1915 = vmatprep.mubr.msk.f32.mxu1 %vm458_vm0, %v328_v10  ;;  %v360_v10 = vld [vmem:[%s2179_s9 + $0x5b8] sm:$0xff] }
  0x6c   : > { %959 = vmatmul.mubr.f32.gmra.mxu0 %v201_v11  ;;  %v233_v11 = vld [vmem:[%s2179_s9 + $0x1c0] sm:$0xff] }
  0x6d   : > { %1853 = vmatprep.mubr.msk.f32.mxu0 %vm458_vm0, %v204_v12  ;;  %v236_v12 = vld [vmem:[%s2179_s9 + $0x1d8] sm:$0xff] }
  0x6e   : > { %1274 = vmatmul.mubr.f32.gmra.mxu1 %v327_v13  ;;  %v359_v13 = vld [vmem:[%s2179_s9 + $0x5b0] sm:$0xff] }
  0x6f   : > { %1916 = vmatprep.mubr.msk.f32.mxu1 %vm458_vm0, %v330_v14  ;;  %v362_v14 = vld [vmem:[%s2179_s9 + $0x5c8] sm:$0xff] }
  0x70   : > { %964 = vmatmul.mubr.f32.gmra.mxu0 %v203_v15  ;;  %v235_v15 = vld [vmem:[%s2179_s9 + $0x1d0] sm:$0xff] }
  0x71   : > { %1854 = vmatprep.mubr.msk.f32.mxu0 %vm458_vm0, %v206_v16  ;;  %v238_v16 = vld [vmem:[%s2179_s9 + $0x1e8] sm:$0xff] }
  0x72   : > { %1279 = vmatmul.mubr.f32.gmra.mxu1 %v329_v17  ;;  %v361_v17 = vld [vmem:[%s2179_s9 + $0x5c0] sm:$0xff] }
  0x73   : > { %1917 = vmatprep.mubr.msk.f32.mxu1 %vm458_vm0, %v332_v18  ;;  %v364_v18 = vld [vmem:[%s2179_s9 + $0x5d8] sm:$0xff] }
  0x74   : > { %969 = vmatmul.mubr.f32.gmra.mxu0 %v205_v19  ;;  %v237_v19 = vld [vmem:[%s2179_s9 + $0x1e0] sm:$0xff] }
  0x75   : > { %1855 = vmatprep.mubr.msk.f32.mxu0 %vm458_vm0, %v208_v20  ;;  %v240_v20 = vld [vmem:[%s2179_s9 + $0x1f8] sm:$0xff] }
  0x76   : > { %1284 = vmatmul.mubr.f32.gmra.mxu1 %v331_v21  ;;  %v363_v21 = vld [vmem:[%s2179_s9 + $0x5d0] sm:$0xff] }
  0x77   : > { %1918 = vmatprep.mubr.msk.f32.mxu1 %vm458_vm0, %v334_v22  ;;  %v366_v22 = vld [vmem:[%s2179_s9 + $0x5e8] sm:$0xff] }
  0x78   : > { %974 = vmatmul.mubr.f32.gmra.mxu0 %v207_v23  ;;  %v239_v23 = vld [vmem:[%s2179_s9 + $0x1f0] sm:$0xff] }
  0x79   : > { %1856 = vmatprep.mubr.msk.f32.mxu0 %vm458_vm0, %v210_v24  ;;  %v242_v24 = vld [vmem:[%s2179_s9 + $0x208] sm:$0xff] }
  0x7a   : > { %1289 = vmatmul.mubr.f32.gmra.mxu1 %v333_v25  ;;  %v365_v25 = vld [vmem:[%s2179_s9 + $0x5e0] sm:$0xff] }
  0x7b   : > { %1919 = vmatprep.mubr.msk.f32.mxu1 %vm458_vm0, %v336_v26  ;;  %v368_v26 = vld [vmem:[%s2179_s9 + $0x5f8] sm:$0xff] }
  0x7c   : > { %979 = vmatmul.mubr.f32.gmra.mxu0 %v209_v27  ;;  %v241_v27 = vld [vmem:[%s2179_s9 + $0x200] sm:$0xff] }
  0x7d   : > { %1857 = vmatprep.mubr.msk.f32.mxu0 %vm458_vm0, %v212_v28  ;;  %v244_v28 = vld [vmem:[%s2179_s9 + $0x218] sm:$0xff] }
  0x7e   : > { %1294 = vmatmul.mubr.f32.gmra.mxu1 %v335_v29  ;;  %v367_v29 = vld [vmem:[%s2179_s9 + $0x5f0] sm:$0xff] }
  0x7f   : > { %1920 = vmatprep.mubr.msk.f32.mxu1 %vm458_vm0, %v338_v30  ;;  %v370_v30 = vld [vmem:[%s2179_s9 + $0x608] sm:$0xff] }
  0x80   : > { %984 = vmatmul.mubr.f32.gmra.mxu0 %v211_v31  ;;  %v243_v31 = vld [vmem:[%s2179_s9 + $0x210] sm:$0xff] }
  0x81   : > { %1858 = vmatprep.mubr.msk.f32.mxu0 %vm458_vm0, %v214_v32  ;;  %v246_v32 = vld [vmem:[%s2179_s9 + $0x228] sm:$0xff] }
  0x82   : > { %1299 = vmatmul.mubr.f32.gmra.mxu1 %v337_v33  ;;  %v369_v33 = vld [vmem:[%s2179_s9 + $0x600] sm:$0xff] }
  0x83   : > { %1921 = vmatprep.mubr.msk.f32.mxu1 %vm458_vm0, %v340_v34  ;;  %v372_v34 = vld [vmem:[%s2179_s9 + $0x618] sm:$0xff] }
  0x84   : > { %989 = vmatmul.mubr.f32.gmra.mxu0 %v213_v35  ;;  %v245_v35 = vld [vmem:[%s2179_s9 + $0x220] sm:$0xff] }
  0x85   : > { %1859 = vmatprep.mubr.msk.f32.mxu0 %vm458_vm0, %v216_v36  ;;  %v248_v36 = vld [vmem:[%s2179_s9 + $0x238] sm:$0xff] }
  0x86   : > { %1304 = vmatmul.mubr.f32.gmra.mxu1 %v339_v37  ;;  %v371_v37 = vld [vmem:[%s2179_s9 + $0x610] sm:$0xff] }
  0x87   : > { %1922 = vmatprep.mubr.msk.f32.mxu1 %vm458_vm0, %v342_v38  ;;  %v374_v38 = vld [vmem:[%s2179_s9 + $0x628] sm:$0xff] }
  0x88   : > { %994 = vmatmul.mubr.f32.gmra.mxu0 %v215_v39  ;;  %v247_v39 = vld [vmem:[%s2179_s9 + $0x230] sm:$0xff] }
  0x89   : > { %1860 = vmatprep.mubr.msk.f32.mxu0 %vm458_vm0, %v218_v40  ;;  %v250_v40 = vld [vmem:[%s2179_s9 + $0x248] sm:$0xff] }
  0x8a   : > { %1309 = vmatmul.mubr.f32.gmra.mxu1 %v341_v41  ;;  %v373_v41 = vld [vmem:[%s2179_s9 + $0x620] sm:$0xff] }
  0x8b   : > { %1923 = vmatprep.mubr.msk.f32.mxu1 %vm458_vm0, %v344_v42  ;;  %v376_v42 = vld [vmem:[%s2179_s9 + $0x638] sm:$0xff] }
  0x8c   : > { %999 = vmatmul.mubr.f32.gmra.mxu0 %v217_v43  ;;  %v249_v43 = vld [vmem:[%s2179_s9 + $0x240] sm:$0xff] }
  0x8d   : > { %1861 = vmatprep.mubr.msk.f32.mxu0 %vm458_vm0, %v220_v44  ;;  %v252_v44 = vld [vmem:[%s2179_s9 + $0x258] sm:$0xff] }
  0x8e   : > { %1314 = vmatmul.mubr.f32.gmra.mxu1 %v343_v45  ;;  %v375_v45 = vld [vmem:[%s2179_s9 + $0x630] sm:$0xff] }
  0x8f   : > { %1924 = vmatprep.mubr.msk.f32.mxu1 %vm458_vm0, %v346_v46  ;;  %v378_v46 = vld [vmem:[%s2179_s9 + $0x648] sm:$0xff] }
  0x90   : > { %1004 = vmatmul.mubr.f32.gmra.mxu0 %v219_v47  ;;  %v251_v47 = vld [vmem:[%s2179_s9 + $0x250] sm:$0xff] }
  0x91   : > { %1862 = vmatprep.mubr.msk.f32.mxu0 %vm458_vm0, %v222_v48  ;;  %v254_v48 = vld [vmem:[%s2179_s9 + $0x268] sm:$0xff] }
  0x92   : > { %1319 = vmatmul.mubr.f32.gmra.mxu1 %v345_v49  ;;  %v377_v49 = vld [vmem:[%s2179_s9 + $0x640] sm:$0xff] }
  0x93   : > { %1925 = vmatprep.mubr.msk.f32.mxu1 %vm458_vm0, %v348_v50  ;;  %v380_v50 = vld [vmem:[%s2179_s9 + $0x658] sm:$0xff] }
  0x94   : > { %1009 = vmatmul.mubr.f32.gmra.mxu0 %v221_v51  ;;  %v253_v51 = vld [vmem:[%s2179_s9 + $0x260] sm:$0xff] }
  0x95   : > { %1863 = vmatprep.mubr.msk.f32.mxu0 %vm458_vm0, %v224_v52  ;;  %v256_v52 = vld [vmem:[%s2179_s9 + $0x278] sm:$0xff] }
  0x96   : > { %1324 = vmatmul.mubr.f32.gmra.mxu1 %v347_v53  ;;  %v379_v53 = vld [vmem:[%s2179_s9 + $0x650] sm:$0xff] }
  0x97   : > { %1926 = vmatprep.mubr.msk.f32.mxu1 %vm458_vm0, %v350_v54  ;;  %v382_v54 = vld [vmem:[%s2179_s9 + $0x668] sm:$0xff] }
  0x98   : > { %1014 = vmatmul.mubr.f32.gmra.mxu0 %v223_v55  ;;  %v255_v55 = vld [vmem:[%s2179_s9 + $0x270] sm:$0xff] }
  0x99   : > { %1864 = vmatprep.mubr.msk.f32.mxu0 %vm458_vm0, %v226_v56  ;;  %v258_v56 = vld [vmem:[%s2179_s9 + $0x288] sm:$0xff] }
  0x9a   : > { %1329 = vmatmul.mubr.f32.gmra.mxu1 %v349_v57  ;;  %v381_v57 = vld [vmem:[%s2179_s9 + $0x660] sm:$0xff] }
  0x9b   : > { %1927 = vmatprep.mubr.msk.f32.mxu1 %vm458_vm0, %v352_v58  ;;  %v384_v58 = vld [vmem:[%s2179_s9 + $0x678] sm:$0xff] }
  0x9c   : > { %1019 = vmatmul.mubr.f32.gmra.mxu0 %v225_v59  ;;  %v257_v59 = vld [vmem:[%s2179_s9 + $0x280] sm:$0xff] }
  0x9d   : > { %1865 = vmatprep.mubr.msk.f32.mxu0 %vm458_vm0, %v228_v60  ;;  %v260_v60 = vld [vmem:[%s2179_s9 + $0x298] sm:$0xff] }
  0x9e   : > { %1334 = vmatmul.mubr.f32.gmra.mxu1 %v351_v61  ;;  %v383_v61 = vld [vmem:[%s2179_s9 + $0x670] sm:$0xff] }
  0x9f   : > { %1928 = vmatprep.mubr.msk.f32.mxu1 %vm458_vm0, %v354_v62  ;;  %v386_v62 = vld [vmem:[%s2179_s9 + $0x688] sm:$0xff] }
  0xa0   : > { %1024 = vmatmul.mubr.f32.gmra.mxu0 %v227_v63  ;;  %v259_v63 = vld [vmem:[%s2179_s9 + $0x290] sm:$0xff] }
  0xa1   : > { %1866 = vmatprep.mubr.msk.f32.mxu0 %vm458_vm0, %v230_v0  ;;  %v262_v0 = vld [vmem:[%s2179_s9 + $0x2a8] sm:$0xff] }
  0xa2   : > { %1339 = vmatmul.mubr.f32.gmra.mxu1 %v353_v1  ;;  %v385_v1 = vld [vmem:[%s2179_s9 + $0x680] sm:$0xff] }
  0xa3   : > { %1929 = vmatprep.mubr.msk.f32.mxu1 %vm458_vm0, %v356_v2  ;;  %v388_v2 = vld [vmem:[%s2179_s9 + $0x698] sm:$0xff] }
  0xa4   : > { %1029 = vmatmul.mubr.f32.gmra.mxu0 %v229_v3  ;;  %v261_v3 = vld [vmem:[%s2179_s9 + $0x2a0] sm:$0xff] }
  0xa5   : > { %1867 = vmatprep.mubr.msk.f32.mxu0 %vm458_vm0, %v232_v4  ;;  %v264_v4 = vld [vmem:[%s2179_s9 + $0x2b8] sm:$0xff] }
  0xa6   : > { %1344 = vmatmul.mubr.f32.gmra.mxu1 %v355_v5  ;;  %v387_v5 = vld [vmem:[%s2179_s9 + $0x690] sm:$0xff] }
  0xa7   : > { %1930 = vmatprep.mubr.msk.f32.mxu1 %vm458_vm0, %v358_v6  ;;  %v390_v6 = vld [vmem:[%s2179_s9 + $0x6a8] sm:$0xff] }
  0xa8   : > { %1034 = vmatmul.mubr.f32.gmra.mxu0 %v231_v7  ;;  %v263_v7 = vld [vmem:[%s2179_s9 + $0x2b0] sm:$0xff] }
  0xa9   : > { %1868 = vmatprep.mubr.msk.f32.mxu0 %vm458_vm0, %v234_v8  ;;  %v266_v8 = vld [vmem:[%s2179_s9 + $0x2c8] sm:$0xff] }
  0xaa   : > { %1349 = vmatmul.mubr.f32.gmra.mxu1 %v357_v9  ;;  %v389_v9 = vld [vmem:[%s2179_s9 + $0x6a0] sm:$0xff] }
  0xab   : > { %1931 = vmatprep.mubr.msk.f32.mxu1 %vm458_vm0, %v360_v10  ;;  %v392_v10 = vld [vmem:[%s2179_s9 + $0x6b8] sm:$0xff] }
  0xac   : > { %1039 = vmatmul.mubr.f32.gmra.mxu0 %v233_v11  ;;  %v265_v11 = vld [vmem:[%s2179_s9 + $0x2c0] sm:$0xff] }
  0xad   : > { %1869 = vmatprep.mubr.msk.f32.mxu0 %vm458_vm0, %v236_v12  ;;  %v268_v12 = vld [vmem:[%s2179_s9 + $0x2d8] sm:$0xff] }
  0xae   : > { %1354 = vmatmul.mubr.f32.gmra.mxu1 %v359_v13  ;;  %v391_v13 = vld [vmem:[%s2179_s9 + $0x6b0] sm:$0xff] }
  0xaf   : > { %1932 = vmatprep.mubr.msk.f32.mxu1 %vm458_vm0, %v362_v14  ;;  %v394_v14 = vld [vmem:[%s2179_s9 + $0x6c8] sm:$0xff] }
  0xb0   : > { %1044 = vmatmul.mubr.f32.gmra.mxu0 %v235_v15  ;;  %v267_v15 = vld [vmem:[%s2179_s9 + $0x2d0] sm:$0xff] }
  0xb1   : > { %1870 = vmatprep.mubr.msk.f32.mxu0 %vm458_vm0, %v238_v16  ;;  %v270_v16 = vld [vmem:[%s2179_s9 + $0x2e8] sm:$0xff] }
  0xb2   : > { %1359 = vmatmul.mubr.f32.gmra.mxu1 %v361_v17  ;;  %v393_v17 = vld [vmem:[%s2179_s9 + $0x6c0] sm:$0xff] }
  0xb3   : > { %1933 = vmatprep.mubr.msk.f32.mxu1 %vm458_vm0, %v364_v18  ;;  %v396_v18 = vld [vmem:[%s2179_s9 + $0x6d8] sm:$0xff] }
  0xb4   : > { %1049 = vmatmul.mubr.f32.gmra.mxu0 %v237_v19  ;;  %v269_v19 = vld [vmem:[%s2179_s9 + $0x2e0] sm:$0xff] }
  0xb5   : > { %1871 = vmatprep.mubr.msk.f32.mxu0 %vm458_vm0, %v240_v20  ;;  %v272_v20 = vld [vmem:[%s2179_s9 + $0x2f8] sm:$0xff] }
  0xb6   : > { %1364 = vmatmul.mubr.f32.gmra.mxu1 %v363_v21  ;;  %v395_v21 = vld [vmem:[%s2179_s9 + $0x6d0] sm:$0xff] }
  0xb7   : > { %1934 = vmatprep.mubr.msk.f32.mxu1 %vm458_vm0, %v366_v22  ;;  %v398_v22 = vld [vmem:[%s2179_s9 + $0x6e8] sm:$0xff] }
  0xb8   : > { %1054 = vmatmul.mubr.f32.gmra.mxu0 %v239_v23  ;;  %v271_v23 = vld [vmem:[%s2179_s9 + $0x2f0] sm:$0xff] }
  0xb9   : > { %1872 = vmatprep.mubr.msk.f32.mxu0 %vm458_vm0, %v242_v24  ;;  %v274_v24 = vld [vmem:[%s2179_s9 + $0x308] sm:$0xff] }
  0xba   : > { %1369 = vmatmul.mubr.f32.gmra.mxu1 %v365_v25  ;;  %v397_v25 = vld [vmem:[%s2179_s9 + $0x6e0] sm:$0xff] }
  0xbb   : > { %1935 = vmatprep.mubr.msk.f32.mxu1 %vm458_vm0, %v368_v26  ;;  %v400_v26 = vld [vmem:[%s2179_s9 + $0x6f8] sm:$0xff] }
  0xbc   : > { %1059 = vmatmul.mubr.f32.gmra.mxu0 %v241_v27  ;;  %v273_v27 = vld [vmem:[%s2179_s9 + $0x300] sm:$0xff] }
  0xbd   : > { %1873 = vmatprep.mubr.msk.f32.mxu0 %vm458_vm0, %v244_v28  ;;  %v2488_v28 = vld [vmem:[%s2964_s2] ss:$0 sm:$0xff] }
  0xbe   : > { %1374 = vmatmul.mubr.f32.gmra.mxu1 %v367_v29  ;;  %v276_v29 = vld [vmem:[%s2179_s9 + $0x318] sm:$0xff] }
  0xbf   : > { %1936 = vmatprep.mubr.msk.f32.mxu1 %vm458_vm0, %v370_v30  ;;  %v399_v30 = vld [vmem:[%s2179_s9 + $0x6f0] sm:$0xff] }
  0xc0   : > { %1064 = vmatmul.mubr.f32.gmra.mxu0 %v243_v31 }
  0xc1   : > { %1874 = vmatprep.mubr.msk.f32.mxu0 %vm458_vm0, %v246_v32  ;;  %v402_v32 = vld [vmem:[%s2179_s9 + $0x708] sm:$0xff] }
  0xc2   : > { %1379 = vmatmul.mubr.f32.gmra.mxu1 %v369_v33 }
  0xc3   : > { %1937 = vmatprep.mubr.msk.f32.mxu1 %vm458_vm0, %v372_v34  ;;  %v275_v34 = vld [vmem:[%s2179_s9 + $0x310] sm:$0xff] }
  0xc4   : > { %1069 = vmatmul.mubr.f32.gmra.mxu0 %v245_v35 }
  0xc5   : > { %1875 = vmatprep.mubr.msk.f32.mxu0 %vm458_vm0, %v248_v36 }
  0xc6   : > { %1384 = vmatmul.mubr.f32.gmra.mxu1 %v371_v37  ;;  %v278_v37 = vld [vmem:[%s2179_s9 + $0x328] sm:$0xff] }
  0xc7   : > { %1938 = vmatprep.mubr.msk.f32.mxu1 %vm458_vm0, %v374_v38 }
  0xc8   : > { %1074 = vmatmul.mubr.f32.gmra.mxu0 %v247_v39 }
  0xc9   : > { %1876 = vmatprep.mubr.msk.f32.mxu0 %vm458_vm0, %v250_v40  ;;  %v401_v40 = vld [vmem:[%s2179_s9 + $0x700] sm:$0xff] }
  0xca   : > { %1389 = vmatmul.mubr.f32.gmra.mxu1 %v373_v41 }
  0xcb   : > { %1939 = vmatprep.mubr.msk.f32.mxu1 %vm458_vm0, %v376_v42 }
  0xcc   : > { %1079 = vmatmul.mubr.f32.gmra.mxu0 %v249_v43  ;;  %v404_v43 = vld [vmem:[%s2179_s9 + $0x718] sm:$0xff] }
  0xcd   : > { %1877 = vmatprep.mubr.msk.f32.mxu0 %vm458_vm0, %v252_v44 }
  0xce   : > { %1394 = vmatmul.mubr.f32.gmra.mxu1 %v375_v45 }
  0xcf   : > { %1940 = vmatprep.mubr.msk.f32.mxu1 %vm458_vm0, %v378_v46  ;;  %v277_v46 = vld [vmem:[%s2179_s9 + $0x320] sm:$0xff] }
  0xd0   : > { %1084 = vmatmul.mubr.f32.gmra.mxu0 %v251_v47 }
  0xd1   : > { %1878 = vmatprep.mubr.msk.f32.mxu0 %vm458_vm0, %v254_v48 }
  0xd2   : > { %1399 = vmatmul.mubr.f32.gmra.mxu1 %v377_v49  ;;  %v280_v49 = vld [vmem:[%s2179_s9 + $0x338] sm:$0xff] }
  0xd3   : > { %1941 = vmatprep.mubr.msk.f32.mxu1 %vm458_vm0, %v380_v50 }
  0xd4   : > { %1089 = vmatmul.mubr.f32.gmra.mxu0 %v253_v51 }
  0xd5   : > { %1879 = vmatprep.mubr.msk.f32.mxu0 %vm458_vm0, %v256_v52  ;;  %v403_v52 = vld [vmem:[%s2179_s9 + $0x710] sm:$0xff] }
  0xd6   : > { %1404 = vmatmul.mubr.f32.gmra.mxu1 %v379_v53 }
  0xd7   : > { %1942 = vmatprep.mubr.msk.f32.mxu1 %vm458_vm0, %v382_v54 }
  0xd8   : > { %1094 = vmatmul.mubr.f32.gmra.mxu0 %v255_v55  ;;  %v406_v55 = vld [vmem:[%s2179_s9 + $0x728] sm:$0xff] }
  0xd9   : > { %1880 = vmatprep.mubr.msk.f32.mxu0 %vm458_vm0, %v258_v56 }
  0xda   : > { %1409 = vmatmul.mubr.f32.gmra.mxu1 %v381_v57 }
  0xdb   : > { %1943 = vmatprep.mubr.msk.f32.mxu1 %vm458_vm0, %v384_v58  ;;  %v279_v58 = vld [vmem:[%s2179_s9 + $0x330] sm:$0xff] }
  0xdc   : > { %1099 = vmatmul.mubr.f32.gmra.mxu0 %v257_v59 }
  0xdd   : > { %1881 = vmatprep.mubr.msk.f32.mxu0 %vm458_vm0, %v260_v60 }
  0xde   : > { %1414 = vmatmul.mubr.f32.gmra.mxu1 %v383_v61  ;;  %v282_v61 = vld [vmem:[%s2179_s9 + $0x348] sm:$0xff] }
  0xdf   : > { %1944 = vmatprep.mubr.msk.f32.mxu1 %vm458_vm0, %v386_v62 }
  0xe0   : > { %1104 = vmatmul.mubr.f32.gmra.mxu0 %v259_v63 }
  0xe1   : > { %1882 = vmatprep.mubr.msk.f32.mxu0 %vm458_vm0, %v262_v0  ;;  %v405_v0 = vld [vmem:[%s2179_s9 + $0x720] sm:$0xff] }
  0xe2   : > { %1419 = vmatmul.mubr.f32.gmra.mxu1 %v385_v1 }
  0xe3   : > { %1945 = vmatprep.mubr.msk.f32.mxu1 %vm458_vm0, %v388_v2 }
  0xe4   : > { %1109 = vmatmul.mubr.f32.gmra.mxu0 %v261_v3  ;;  %v408_v3 = vld [vmem:[%s2179_s9 + $0x738] sm:$0xff] }
  0xe5   : > { %1883 = vmatprep.mubr.msk.f32.mxu0 %vm458_vm0, %v264_v4 }
  0xe6   : > { %1424 = vmatmul.mubr.f32.gmra.mxu1 %v387_v5 }
  0xe7   : > { %1946 = vmatprep.mubr.msk.f32.mxu1 %vm458_vm0, %v390_v6  ;;  %v281_v6 = vld [vmem:[%s2179_s9 + $0x340] sm:$0xff] }
  0xe8   : > { %1114 = vmatmul.mubr.f32.gmra.mxu0 %v263_v7 }
  0xe9   : > { %1884 = vmatprep.mubr.msk.f32.mxu0 %vm458_vm0, %v266_v8 }
  0xea   : > { %1429 = vmatmul.mubr.f32.gmra.mxu1 %v389_v9  ;;  %v284_v9 = vld [vmem:[%s2179_s9 + $0x358] sm:$0xff] }
  0xeb   : > { %1947 = vmatprep.mubr.msk.f32.mxu1 %vm458_vm0, %v392_v10 }
  0xec   : > { %1119 = vmatmul.mubr.f32.gmra.mxu0 %v265_v11 }
  0xed   : > { %1885 = vmatprep.mubr.msk.f32.mxu0 %vm458_vm0, %v268_v12  ;;  %v407_v12 = vld [vmem:[%s2179_s9 + $0x730] sm:$0xff] }
  0xee   : > { %1434 = vmatmul.mubr.f32.gmra.mxu1 %v391_v13 }
  0xef   : > { %1948 = vmatprep.mubr.msk.f32.mxu1 %vm458_vm0, %v394_v14 }
  0xf0   : > { %1124 = vmatmul.mubr.f32.gmra.mxu0 %v267_v15  ;;  %v410_v15 = vld [vmem:[%s2179_s9 + $0x748] sm:$0xff] }
  0xf1   : > { %1886 = vmatprep.mubr.msk.f32.mxu0 %vm458_vm0, %v270_v16 }
  0xf2   : > { %1439 = vmatmul.mubr.f32.gmra.mxu1 %v393_v17 }
  0xf3   : > { %1949 = vmatprep.mubr.msk.f32.mxu1 %vm458_vm0, %v396_v18  ;;  %v283_v18 = vld [vmem:[%s2179_s9 + $0x350] sm:$0xff] }
  0xf4   : > { %1129 = vmatmul.mubr.f32.gmra.mxu0 %v269_v19 }
  0xf5   : > { %1887 = vmatprep.mubr.msk.f32.mxu0 %vm458_vm0, %v272_v20 }
  0xf6   : > { %1444 = vmatmul.mubr.f32.gmra.mxu1 %v395_v21  ;;  %v286_v21 = vld [vmem:[%s2179_s9 + $0x368] sm:$0xff] }
  0xf7   : > { %1950 = vmatprep.mubr.msk.f32.mxu1 %vm458_vm0, %v398_v22 }
  0xf8   : > { %1134 = vmatmul.mubr.f32.gmra.mxu0 %v271_v23 }
  0xf9   : > { %1888 = vmatprep.mubr.msk.f32.mxu0 %vm458_vm0, %v274_v24  ;;  %v409_v24 = vld [vmem:[%s2179_s9 + $0x740] sm:$0xff] }
  0xfa   : > { %1449 = vmatmul.mubr.f32.gmra.mxu1 %v397_v25 }
  0xfb   : > { %1951 = vmatprep.mubr.msk.f32.mxu1 %vm458_vm0, %v400_v26 }
  0xfc   : > { %v900_v31 = vpop.f32.mrf.mxu0  ;;  %1139 = vmatmul.mubr.f32.gmra.mxu0 %v273_v27  ;;  %v412_v27 = vld [vmem:[%s2179_s9 + $0x758] sm:$0xff] }
  0xfd   : > { %v901_v33 = vadd.f32 %v2488_v28, %v900_v31  ;;  %1889 = vmatprep.mubr.msk.f32.mxu0 %vm458_vm0, %v276_v29  ;;  %v285_v31 = vld [vmem:[%s2179_s9 + $0x360] sm:$0xff] }
  0xfe   : > { %v902_v35 = vpop.f32.mrf.mxu0  ;;  %v1215_v36 = vpop.f32.mrf.mxu1  ;;  %1454 = vmatmul.mubr.f32.gmra.mxu1 %v399_v30 }
  0xff   : > { %v1524_v38 = vmax.f32 %v901_v33, 0.0  ;;  %v1216_v39 = vadd.f32 %v2488_v28, %v1215_v36  ;;  %1952 = vmatprep.mubr.msk.f32.mxu1 %vm458_vm0, %v402_v32 }
 0x100   : > { %v905_v41 = vpop.f32.mrf.mxu0  ;;  %1144 = vmatmul.mubr.f32.gmra.mxu0 %v275_v34  ;;  %v1217_v42 = vpop.f32.mrf.mxu1  ;;  %v288_v34 = vld [vmem:[%s2179_s9 + $0x378] sm:$0xff] }
 0x101   : > { %1650 = vst.msk [vmem:[%s2501_s13] sm:$0xff] %vm1649_vm1, %v1524_v38  ;;  %v1587_v44 = vmax.f32 %v1216_v39, 0.0  ;;  %v906_v45 = vadd.f32 %v2488_v28, %v905_v41  ;;  %1890 = vmatprep.mubr.msk.f32.mxu0 %vm458_vm0, %v278_v37  ;;  %v411_v37 = vld [vmem:[%s2179_s9 + $0x750] sm:$0xff] }
 0x102   : > { %v907_v47 = vpop.f32.mrf.mxu0  ;;  %v1220_v48 = vpop.f32.mrf.mxu1  ;;  %1459 = vmatmul.mubr.f32.gmra.mxu1 %v401_v40  ;;  %v414_v40 = vld [vmem:[%s2179_s9 + $0x768] sm:$0xff] }
 0x103   : > { %1713 = vst.msk [vmem:[%s2501_s13 + $0x1f8] sm:$0xff] %vm1649_vm1, %v1587_v44  ;;  %v1525_v50 = vmax.f32 %v906_v45, 0.0  ;;  %v1221_v51 = vadd.f32 %v2488_v28, %v1220_v48  ;;  %1953 = vmatprep.mubr.msk.f32.mxu1 %vm458_vm0, %v404_v43  ;;  %v287_v43 = vld [vmem:[%s2179_s9 + $0x370] sm:$0xff] }
 0x104   : > { %v910_v53 = vpop.f32.mrf.mxu0  ;;  %1149 = vmatmul.mubr.f32.gmra.mxu0 %v277_v46  ;;  %v1222_v54 = vpop.f32.mrf.mxu1  ;;  %v290_v46 = vld [vmem:[%s2179_s9 + $0x388] sm:$0xff] }
 0x105   : > { %1651 = vst.msk [vmem:[%s2501_s13 + $0x8] sm:$0xff] %vm1649_vm1, %v1525_v50  ;;  %v1588_v56 = vmax.f32 %v1221_v51, 0.0  ;;  %v911_v57 = vadd.f32 %v2488_v28, %v910_v53  ;;  %1891 = vmatprep.mubr.msk.f32.mxu0 %vm458_vm0, %v280_v49  ;;  %v413_v49 = vld [vmem:[%s2179_s9 + $0x760] sm:$0xff] }
 0x106   : > { %v912_v59 = vpop.f32.mrf.mxu0  ;;  %v1225_v60 = vpop.f32.mrf.mxu1  ;;  %1464 = vmatmul.mubr.f32.gmra.mxu1 %v403_v52  ;;  %v416_v52 = vld [vmem:[%s2179_s9 + $0x778] sm:$0xff] }
 0x107   : > { %1714 = vst.msk [vmem:[%s2501_s13 + $0x200] sm:$0xff] %vm1649_vm1, %v1588_v56  ;;  %v1526_v62 = vmax.f32 %v911_v57, 0.0  ;;  %v1226_v63 = vadd.f32 %v2488_v28, %v1225_v60  ;;  %1954 = vmatprep.mubr.msk.f32.mxu1 %vm458_vm0, %v406_v55  ;;  %v289_v55 = vld [vmem:[%s2179_s9 + $0x380] sm:$0xff] }
 0x108   : > { %v915_v1 = vpop.f32.mrf.mxu0  ;;  %1154 = vmatmul.mubr.f32.gmra.mxu0 %v279_v58  ;;  %v1227_v2 = vpop.f32.mrf.mxu1  ;;  %v292_v58 = vld [vmem:[%s2179_s9 + $0x398] sm:$0xff] }
 0x109   : > { %1652 = vst.msk [vmem:[%s2501_s13 + $0x10] sm:$0xff] %vm1649_vm1, %v1526_v62  ;;  %v1589_v4 = vmax.f32 %v1226_v63, 0.0  ;;  %v916_v5 = vadd.f32 %v2488_v28, %v915_v1  ;;  %1892 = vmatprep.mubr.msk.f32.mxu0 %vm458_vm0, %v282_v61  ;;  %v415_v61 = vld [vmem:[%s2179_s9 + $0x770] sm:$0xff] }
 0x10a   : > { %v917_v7 = vpop.f32.mrf.mxu0  ;;  %v1230_v8 = vpop.f32.mrf.mxu1  ;;  %1469 = vmatmul.mubr.f32.gmra.mxu1 %v405_v0  ;;  %v418_v0 = vld [vmem:[%s2179_s9 + $0x788] sm:$0xff] }
 0x10b   : > { %1715 = vst.msk [vmem:[%s2501_s13 + $0x208] sm:$0xff] %vm1649_vm1, %v1589_v4  ;;  %v1527_v10 = vmax.f32 %v916_v5, 0.0  ;;  %v1231_v11 = vadd.f32 %v2488_v28, %v1230_v8  ;;  %1955 = vmatprep.mubr.msk.f32.mxu1 %vm458_vm0, %v408_v3  ;;  %v291_v3 = vld [vmem:[%s2179_s9 + $0x390] sm:$0xff] }
 0x10c   : > { %v920_v13 = vpop.f32.mrf.mxu0  ;;  %1159 = vmatmul.mubr.f32.gmra.mxu0 %v281_v6  ;;  %v1232_v14 = vpop.f32.mrf.mxu1  ;;  %v294_v6 = vld [vmem:[%s2179_s9 + $0x3a8] sm:$0xff] }
 0x10d   : > { %1653 = vst.msk [vmem:[%s2501_s13 + $0x18] sm:$0xff] %vm1649_vm1, %v1527_v10  ;;  %v1590_v16 = vmax.f32 %v1231_v11, 0.0  ;;  %v921_v17 = vadd.f32 %v2488_v28, %v920_v13  ;;  %1893 = vmatprep.mubr.msk.f32.mxu0 %vm458_vm0, %v284_v9  ;;  %v417_v9 = vld [vmem:[%s2179_s9 + $0x780] sm:$0xff] }
 0x10e   : > { %v922_v19 = vpop.f32.mrf.mxu0  ;;  %v1235_v20 = vpop.f32.mrf.mxu1  ;;  %1474 = vmatmul.mubr.f32.gmra.mxu1 %v407_v12  ;;  %v420_v12 = vld [vmem:[%s2179_s9 + $0x798] sm:$0xff] }
 0x10f   : > { %1716 = vst.msk [vmem:[%s2501_s13 + $0x210] sm:$0xff] %vm1649_vm1, %v1590_v16  ;;  %v1528_v22 = vmax.f32 %v921_v17, 0.0  ;;  %v1236_v23 = vadd.f32 %v2488_v28, %v1235_v20  ;;  %1956 = vmatprep.mubr.msk.f32.mxu1 %vm458_vm0, %v410_v15  ;;  %v293_v15 = vld [vmem:[%s2179_s9 + $0x3a0] sm:$0xff] }
 0x110   : > { %v925_v25 = vpop.f32.mrf.mxu0  ;;  %1164 = vmatmul.mubr.f32.gmra.mxu0 %v283_v18  ;;  %v1237_v26 = vpop.f32.mrf.mxu1  ;;  %v296_v18 = vld [vmem:[%s2179_s9 + $0x3b8] sm:$0xff] }
 0x111   : > { %1654 = vst.msk [vmem:[%s2501_s13 + $0x20] sm:$0xff] %vm1649_vm1, %v1528_v22  ;;  %v1591_v29 = vmax.f32 %v1236_v23, 0.0  ;;  %v926_v30 = vadd.f32 %v2488_v28, %v925_v25  ;;  %1894 = vmatprep.mubr.msk.f32.mxu0 %vm458_vm0, %v286_v21  ;;  %v419_v21 = vld [vmem:[%s2179_s9 + $0x790] sm:$0xff] }
 0x112   : > { %v927_v32 = vpop.f32.mrf.mxu0  ;;  %v1240_v33 = vpop.f32.mrf.mxu1  ;;  %1479 = vmatmul.mubr.f32.gmra.mxu1 %v409_v24  ;;  %v422_v24 = vld [vmem:[%s2179_s9 + $0x7a8] sm:$0xff] }
 0x113   : > { %1717 = vst.msk [vmem:[%s2501_s13 + $0x218] sm:$0xff] %vm1649_vm1, %v1591_v29  ;;  %v1529_v35 = vmax.f32 %v926_v30, 0.0  ;;  %v1241_v36 = vadd.f32 %v2488_v28, %v1240_v33  ;;  %1957 = vmatprep.mubr.msk.f32.mxu1 %vm458_vm0, %v412_v27  ;;  %v295_v27 = vld [vmem:[%s2179_s9 + $0x3b0] sm:$0xff] }
 0x114   : > { %v930_v38 = vpop.f32.mrf.mxu0  ;;  %1169 = vmatmul.mubr.f32.gmra.mxu0 %v285_v31  ;;  %v1242_v39 = vpop.f32.mrf.mxu1  ;;  %v298_v31 = vld [vmem:[%s2179_s9 + $0x3c8] sm:$0xff] }
 0x115   : > { %1655 = vst.msk [vmem:[%s2501_s13 + $0x28] sm:$0xff] %vm1649_vm1, %v1529_v35  ;;  %v1592_v41 = vmax.f32 %v1241_v36, 0.0  ;;  %v931_v42 = vadd.f32 %v2488_v28, %v930_v38  ;;  %1895 = vmatprep.mubr.msk.f32.mxu0 %vm458_vm0, %v288_v34  ;;  %v421_v34 = vld [vmem:[%s2179_s9 + $0x7a0] sm:$0xff] }
 0x116   : > { %v932_v44 = vpop.f32.mrf.mxu0  ;;  %v1245_v45 = vpop.f32.mrf.mxu1  ;;  %1484 = vmatmul.mubr.f32.gmra.mxu1 %v411_v37  ;;  %v424_v37 = vld [vmem:[%s2179_s9 + $0x7b8] sm:$0xff] }
 0x117   : > { %1718 = vst.msk [vmem:[%s2501_s13 + $0x220] sm:$0xff] %vm1649_vm1, %v1592_v41  ;;  %v1530_v47 = vmax.f32 %v931_v42, 0.0  ;;  %v1246_v48 = vadd.f32 %v2488_v28, %v1245_v45  ;;  %1958 = vmatprep.mubr.msk.f32.mxu1 %vm458_vm0, %v414_v40  ;;  %v297_v40 = vld [vmem:[%s2179_s9 + $0x3c0] sm:$0xff] }
 0x118   : > { %v935_v50 = vpop.f32.mrf.mxu0  ;;  %1174 = vmatmul.mubr.f32.gmra.mxu0 %v287_v43  ;;  %v1247_v51 = vpop.f32.mrf.mxu1  ;;  %v300_v43 = vld [vmem:[%s2179_s9 + $0x3d8] sm:$0xff] }
 0x119   : > { %1656 = vst.msk [vmem:[%s2501_s13 + $0x30] sm:$0xff] %vm1649_vm1, %v1530_v47  ;;  %v1593_v53 = vmax.f32 %v1246_v48, 0.0  ;;  %v936_v54 = vadd.f32 %v2488_v28, %v935_v50  ;;  %1896 = vmatprep.mubr.msk.f32.mxu0 %vm458_vm0, %v290_v46  ;;  %v423_v46 = vld [vmem:[%s2179_s9 + $0x7b0] sm:$0xff] }
 0x11a   : > { %v937_v56 = vpop.f32.mrf.mxu0  ;;  %v1250_v57 = vpop.f32.mrf.mxu1  ;;  %1489 = vmatmul.mubr.f32.gmra.mxu1 %v413_v49  ;;  %v426_v49 = vld [vmem:[%s2179_s9 + $0x7c8] sm:$0xff] }
 0x11b   : > { %1719 = vst.msk [vmem:[%s2501_s13 + $0x228] sm:$0xff] %vm1649_vm1, %v1593_v53  ;;  %v1531_v59 = vmax.f32 %v936_v54, 0.0  ;;  %v1251_v60 = vadd.f32 %v2488_v28, %v1250_v57  ;;  %1959 = vmatprep.mubr.msk.f32.mxu1 %vm458_vm0, %v416_v52  ;;  %v299_v52 = vld [vmem:[%s2179_s9 + $0x3d0] sm:$0xff] }
 0x11c   : > { %v940_v62 = vpop.f32.mrf.mxu0  ;;  %1179 = vmatmul.mubr.f32.gmra.mxu0 %v289_v55  ;;  %v1252_v63 = vpop.f32.mrf.mxu1  ;;  %v302_v55 = vld [vmem:[%s2179_s9 + $0x3e8] sm:$0xff] }
 0x11d   : > { %1657 = vst.msk [vmem:[%s2501_s13 + $0x38] sm:$0xff] %vm1649_vm1, %v1531_v59  ;;  %v1594_v1 = vmax.f32 %v1251_v60, 0.0  ;;  %v941_v2 = vadd.f32 %v2488_v28, %v940_v62  ;;  %1897 = vmatprep.mubr.msk.f32.mxu0 %vm458_vm0, %v292_v58  ;;  %v425_v58 = vld [vmem:[%s2179_s9 + $0x7c0] sm:$0xff] }
 0x11e   : > { %v942_v4 = vpop.f32.mrf.mxu0  ;;  %v1255_v5 = vpop.f32.mrf.mxu1  ;;  %1494 = vmatmul.mubr.f32.gmra.mxu1 %v415_v61  ;;  %v301_v63 = vld [vmem:[%s2179_s9 + $0x3e0] sm:$0xff] }
 0x11f   : > { %1720 = vst.msk [vmem:[%s2501_s13 + $0x230] sm:$0xff] %vm1649_vm1, %v1594_v1  ;;  %v1532_v7 = vmax.f32 %v941_v2, 0.0  ;;  %v1256_v8 = vadd.f32 %v2488_v28, %v1255_v5  ;;  %1960 = vmatprep.mubr.msk.f32.mxu1 %vm458_vm0, %v418_v0 }
 0x120   : > { %v945_v10 = vpop.f32.mrf.mxu0  ;;  %1184 = vmatmul.mubr.f32.gmra.mxu0 %v291_v3  ;;  %v1257_v11 = vpop.f32.mrf.mxu1 }
 0x121   : > { %1658 = vst.msk [vmem:[%s2501_s13 + $0x40] sm:$0xff] %vm1649_vm1, %v1532_v7  ;;  %v1595_v13 = vmax.f32 %v1256_v8, 0.0  ;;  %v946_v14 = vadd.f32 %v2488_v28, %v945_v10  ;;  %1898 = vmatprep.mubr.msk.f32.mxu0 %vm458_vm0, %v294_v6 }
 0x122   : > { %v947_v16 = vpop.f32.mrf.mxu0  ;;  %v1260_v17 = vpop.f32.mrf.mxu1  ;;  %1499 = vmatmul.mubr.f32.gmra.mxu1 %v417_v9 }
 0x123   : > { %1721 = vst.msk [vmem:[%s2501_s13 + $0x238] sm:$0xff] %vm1649_vm1, %v1595_v13  ;;  %v1533_v19 = vmax.f32 %v946_v14, 0.0  ;;  %v1261_v20 = vadd.f32 %v2488_v28, %v1260_v17  ;;  %1961 = vmatprep.mubr.msk.f32.mxu1 %vm458_vm0, %v420_v12 }
 0x124   : > { %v950_v22 = vpop.f32.mrf.mxu0  ;;  %1189 = vmatmul.mubr.f32.gmra.mxu0 %v293_v15  ;;  %v1262_v23 = vpop.f32.mrf.mxu1 }
 0x125   : > { %1659 = vst.msk [vmem:[%s2501_s13 + $0x48] sm:$0xff] %vm1649_vm1, %v1533_v19  ;;  %v1596_v25 = vmax.f32 %v1261_v20, 0.0  ;;  %v951_v26 = vadd.f32 %v2488_v28, %v950_v22  ;;  %1899 = vmatprep.mubr.msk.f32.mxu0 %vm458_vm0, %v296_v18 }
 0x126   : > { %v952_v29 = vpop.f32.mrf.mxu0  ;;  %v1265_v30 = vpop.f32.mrf.mxu1  ;;  %1504 = vmatmul.mubr.f32.gmra.mxu1 %v419_v21 }
 0x127   : > { %1722 = vst.msk [vmem:[%s2501_s13 + $0x240] sm:$0xff] %vm1649_vm1, %v1596_v25  ;;  %v1534_v32 = vmax.f32 %v951_v26, 0.0  ;;  %v1266_v33 = vadd.f32 %v2488_v28, %v1265_v30  ;;  %1962 = vmatprep.mubr.msk.f32.mxu1 %vm458_vm0, %v422_v24 }
 0x128   : > { %v955_v35 = vpop.f32.mrf.mxu0  ;;  %1194 = vmatmul.mubr.f32.gmra.mxu0 %v295_v27  ;;  %v1267_v36 = vpop.f32.mrf.mxu1 }
 0x129   : > { %1660 = vst.msk [vmem:[%s2501_s13 + $0x50] sm:$0xff] %vm1649_vm1, %v1534_v32  ;;  %v1597_v38 = vmax.f32 %v1266_v33, 0.0  ;;  %v956_v39 = vadd.f32 %v2488_v28, %v955_v35  ;;  %1900 = vmatprep.mubr.msk.f32.mxu0 %vm458_vm0, %v298_v31 }
 0x12a   : > { %v957_v41 = vpop.f32.mrf.mxu0  ;;  %v1270_v42 = vpop.f32.mrf.mxu1  ;;  %1509 = vmatmul.mubr.f32.gmra.mxu1 %v421_v34 }
 0x12b   : > { %1723 = vst.msk [vmem:[%s2501_s13 + $0x248] sm:$0xff] %vm1649_vm1, %v1597_v38  ;;  %v1535_v44 = vmax.f32 %v956_v39, 0.0  ;;  %v1271_v45 = vadd.f32 %v2488_v28, %v1270_v42  ;;  %1963 = vmatprep.mubr.msk.f32.mxu1 %vm458_vm0, %v424_v37 }
 0x12c   : > { %v960_v47 = vpop.f32.mrf.mxu0  ;;  %1199 = vmatmul.mubr.f32.gmra.mxu0 %v297_v40  ;;  %v1272_v48 = vpop.f32.mrf.mxu1 }
 0x12d   : > { %1661 = vst.msk [vmem:[%s2501_s13 + $0x58] sm:$0xff] %vm1649_vm1, %v1535_v44  ;;  %v1598_v50 = vmax.f32 %v1271_v45, 0.0  ;;  %v961_v51 = vadd.f32 %v2488_v28, %v960_v47  ;;  %1901 = vmatprep.mubr.msk.f32.mxu0 %vm458_vm0, %v300_v43 }
 0x12e   : > { %v962_v53 = vpop.f32.mrf.mxu0  ;;  %v1275_v54 = vpop.f32.mrf.mxu1  ;;  %1514 = vmatmul.mubr.f32.gmra.mxu1 %v423_v46 }
 0x12f   : > { %1724 = vst.msk [vmem:[%s2501_s13 + $0x250] sm:$0xff] %vm1649_vm1, %v1598_v50  ;;  %v1536_v56 = vmax.f32 %v961_v51, 0.0  ;;  %v1276_v57 = vadd.f32 %v2488_v28, %v1275_v54  ;;  %1964 = vmatprep.mubr.msk.f32.mxu1 %vm458_vm0, %v426_v49 }
 0x130   : > { %v965_v59 = vpop.f32.mrf.mxu0  ;;  %1204 = vmatmul.mubr.f32.gmra.mxu0 %v299_v52  ;;  %v1277_v60 = vpop.f32.mrf.mxu1 }
 0x131   : > { %1662 = vst.msk [vmem:[%s2501_s13 + $0x60] sm:$0xff] %vm1649_vm1, %v1536_v56  ;;  %v1599_v61 = vmax.f32 %v1276_v57, 0.0  ;;  %v966_v62 = vadd.f32 %v2488_v28, %v965_v59  ;;  %1902 = vmatprep.mubr.msk.f32.mxu0 %vm458_vm0, %v302_v55 }
 0x132   : > { %v967_v0 = vpop.f32.mrf.mxu0  ;;  %v1280_v1 = vpop.f32.mrf.mxu1  ;;  %1519 = vmatmul.mubr.f32.gmra.mxu1 %v425_v58 }
 0x133   : > { %1725 = vst.msk [vmem:[%s2501_s13 + $0x258] sm:$0xff] %vm1649_vm1, %v1599_v61  ;;  %v1537_v2 = vmax.f32 %v966_v62, 0.0  ;;  %v1281_v3 = vadd.f32 %v2488_v28, %v1280_v1 }
 0x134   : > { %v970_v4 = vpop.f32.mrf.mxu0  ;;  %1209 = vmatmul.mubr.f32.gmra.mxu0 %v301_v63  ;;  %v1282_v5 = vpop.f32.mrf.mxu1 }
 0x135   : > { %1663 = vst.msk [vmem:[%s2501_s13 + $0x68] sm:$0xff] %vm1649_vm1, %v1537_v2  ;;  %v1600_v6 = vmax.f32 %v1281_v3, 0.0  ;;  %v971_v7 = vadd.f32 %v2488_v28, %v970_v4 }
 0x136   : > { %v972_v8 = vpop.f32.mrf.mxu0  ;;  %v1285_v9 = vpop.f32.mrf.mxu1 }
 0x137   : > { %1726 = vst.msk [vmem:[%s2501_s13 + $0x260] sm:$0xff] %vm1649_vm1, %v1600_v6  ;;  %v1538_v10 = vmax.f32 %v971_v7, 0.0  ;;  %v1286_v11 = vadd.f32 %v2488_v28, %v1285_v9 }
 0x138   : > { %v975_v12 = vpop.f32.mrf.mxu0  ;;  %v1287_v13 = vpop.f32.mrf.mxu1 }
 0x139   : > { %1664 = vst.msk [vmem:[%s2501_s13 + $0x70] sm:$0xff] %vm1649_vm1, %v1538_v10  ;;  %v1601_v14 = vmax.f32 %v1286_v11, 0.0  ;;  %v976_v15 = vadd.f32 %v2488_v28, %v975_v12 }
 0x13a   : > { %v977_v16 = vpop.f32.mrf.mxu0  ;;  %v1290_v17 = vpop.f32.mrf.mxu1 }
 0x13b   : > { %1727 = vst.msk [vmem:[%s2501_s13 + $0x268] sm:$0xff] %vm1649_vm1, %v1601_v14  ;;  %v1539_v18 = vmax.f32 %v976_v15, 0.0  ;;  %v1291_v19 = vadd.f32 %v2488_v28, %v1290_v17 }
 0x13c   : > { %v980_v20 = vpop.f32.mrf.mxu0  ;;  %v1292_v21 = vpop.f32.mrf.mxu1 }
 0x13d   : > { %1665 = vst.msk [vmem:[%s2501_s13 + $0x78] sm:$0xff] %vm1649_vm1, %v1539_v18  ;;  %v1602_v22 = vmax.f32 %v1291_v19, 0.0  ;;  %v981_v23 = vadd.f32 %v2488_v28, %v980_v20 }
 0x13e   : > { %v982_v24 = vpop.f32.mrf.mxu0  ;;  %v1295_v25 = vpop.f32.mrf.mxu1 }
 0x13f   : > { %1728 = vst.msk [vmem:[%s2501_s13 + $0x270] sm:$0xff] %vm1649_vm1, %v1602_v22  ;;  %v1540_v26 = vmax.f32 %v981_v23, 0.0  ;;  %v1296_v27 = vadd.f32 %v2488_v28, %v1295_v25 }
 0x140   : > { %v985_v29 = vpop.f32.mrf.mxu0  ;;  %v1297_v30 = vpop.f32.mrf.mxu1 }
 0x141   : > { %1666 = vst.msk [vmem:[%s2501_s13 + $0x80] sm:$0xff] %vm1649_vm1, %v1540_v26  ;;  %v1603_v31 = vmax.f32 %v1296_v27, 0.0  ;;  %v986_v32 = vadd.f32 %v2488_v28, %v985_v29 }
 0x142   : > { %v987_v33 = vpop.f32.mrf.mxu0  ;;  %v1300_v34 = vpop.f32.mrf.mxu1 }
 0x143   : > { %1729 = vst.msk [vmem:[%s2501_s13 + $0x278] sm:$0xff] %vm1649_vm1, %v1603_v31  ;;  %v1541_v35 = vmax.f32 %v986_v32, 0.0  ;;  %v1301_v36 = vadd.f32 %v2488_v28, %v1300_v34 }
 0x144   : > { %v990_v37 = vpop.f32.mrf.mxu0  ;;  %v1302_v38 = vpop.f32.mrf.mxu1 }
 0x145   : > { %1667 = vst.msk [vmem:[%s2501_s13 + $0x88] sm:$0xff] %vm1649_vm1, %v1541_v35  ;;  %v1604_v39 = vmax.f32 %v1301_v36, 0.0  ;;  %v991_v40 = vadd.f32 %v2488_v28, %v990_v37 }
 0x146   : > { %v992_v41 = vpop.f32.mrf.mxu0  ;;  %v1305_v42 = vpop.f32.mrf.mxu1 }
 0x147   : > { %1730 = vst.msk [vmem:[%s2501_s13 + $0x280] sm:$0xff] %vm1649_vm1, %v1604_v39  ;;  %v1542_v43 = vmax.f32 %v991_v40, 0.0  ;;  %v1306_v44 = vadd.f32 %v2488_v28, %v1305_v42 }
 0x148   : > { %v995_v45 = vpop.f32.mrf.mxu0  ;;  %v1307_v46 = vpop.f32.mrf.mxu1 }
 0x149   : > { %1668 = vst.msk [vmem:[%s2501_s13 + $0x90] sm:$0xff] %vm1649_vm1, %v1542_v43  ;;  %v1605_v47 = vmax.f32 %v1306_v44, 0.0  ;;  %v996_v48 = vadd.f32 %v2488_v28, %v995_v45 }
 0x14a   : > { %v997_v49 = vpop.f32.mrf.mxu0  ;;  %v1310_v50 = vpop.f32.mrf.mxu1 }
 0x14b   : > { %1731 = vst.msk [vmem:[%s2501_s13 + $0x288] sm:$0xff] %vm1649_vm1, %v1605_v47  ;;  %v1543_v51 = vmax.f32 %v996_v48, 0.0  ;;  %v1311_v52 = vadd.f32 %v2488_v28, %v1310_v50 }
 0x14c   : > { %v1000_v53 = vpop.f32.mrf.mxu0  ;;  %v1312_v54 = vpop.f32.mrf.mxu1 }
 0x14d   : > { %1669 = vst.msk [vmem:[%s2501_s13 + $0x98] sm:$0xff] %vm1649_vm1, %v1543_v51  ;;  %v1606_v55 = vmax.f32 %v1311_v52, 0.0  ;;  %v1001_v56 = vadd.f32 %v2488_v28, %v1000_v53 }
 0x14e   : > { %v1002_v57 = vpop.f32.mrf.mxu0  ;;  %v1315_v58 = vpop.f32.mrf.mxu1 }
 0x14f   : > { %1732 = vst.msk [vmem:[%s2501_s13 + $0x290] sm:$0xff] %vm1649_vm1, %v1606_v55  ;;  %v1544_v59 = vmax.f32 %v1001_v56, 0.0  ;;  %v1316_v60 = vadd.f32 %v2488_v28, %v1315_v58 }
 0x150   : > { %v1005_v61 = vpop.f32.mrf.mxu0  ;;  %v1317_v62 = vpop.f32.mrf.mxu1 }
 0x151   : > { %1670 = vst.msk [vmem:[%s2501_s13 + $0xa0] sm:$0xff] %vm1649_vm1, %v1544_v59  ;;  %v1607_v63 = vmax.f32 %v1316_v60, 0.0  ;;  %v1006_v0 = vadd.f32 %v2488_v28, %v1005_v61 }
 0x152   : > { %v1007_v1 = vpop.f32.mrf.mxu0  ;;  %v1320_v2 = vpop.f32.mrf.mxu1 }
 0x153   : > { %1733 = vst.msk [vmem:[%s2501_s13 + $0x298] sm:$0xff] %vm1649_vm1, %v1607_v63  ;;  %v1545_v3 = vmax.f32 %v1006_v0, 0.0  ;;  %v1321_v4 = vadd.f32 %v2488_v28, %v1320_v2 }
 0x154   : > { %v1010_v5 = vpop.f32.mrf.mxu0  ;;  %v1322_v6 = vpop.f32.mrf.mxu1 }
 0x155   : > { %1671 = vst.msk [vmem:[%s2501_s13 + $0xa8] sm:$0xff] %vm1649_vm1, %v1545_v3  ;;  %v1608_v7 = vmax.f32 %v1321_v4, 0.0  ;;  %v1011_v8 = vadd.f32 %v2488_v28, %v1010_v5 }
 0x156   : > { %v1012_v9 = vpop.f32.mrf.mxu0  ;;  %v1325_v10 = vpop.f32.mrf.mxu1 }
 0x157   : > { %1734 = vst.msk [vmem:[%s2501_s13 + $0x2a0] sm:$0xff] %vm1649_vm1, %v1608_v7  ;;  %v1546_v11 = vmax.f32 %v1011_v8, 0.0  ;;  %v1326_v12 = vadd.f32 %v2488_v28, %v1325_v10 }
 0x158   : > { %v1015_v13 = vpop.f32.mrf.mxu0  ;;  %v1327_v14 = vpop.f32.mrf.mxu1 }
 0x159   : > { %1672 = vst.msk [vmem:[%s2501_s13 + $0xb0] sm:$0xff] %vm1649_vm1, %v1546_v11  ;;  %v1609_v15 = vmax.f32 %v1326_v12, 0.0  ;;  %v1016_v16 = vadd.f32 %v2488_v28, %v1015_v13 }
 0x15a   : > { %v1017_v17 = vpop.f32.mrf.mxu0  ;;  %v1330_v18 = vpop.f32.mrf.mxu1 }
 0x15b   : > { %1735 = vst.msk [vmem:[%s2501_s13 + $0x2a8] sm:$0xff] %vm1649_vm1, %v1609_v15  ;;  %v1547_v19 = vmax.f32 %v1016_v16, 0.0  ;;  %v1331_v20 = vadd.f32 %v2488_v28, %v1330_v18 }
 0x15c   : > { %v1020_v21 = vpop.f32.mrf.mxu0  ;;  %v1332_v22 = vpop.f32.mrf.mxu1 }
 0x15d   : > { %1673 = vst.msk [vmem:[%s2501_s13 + $0xb8] sm:$0xff] %vm1649_vm1, %v1547_v19  ;;  %v1610_v23 = vmax.f32 %v1331_v20, 0.0  ;;  %v1021_v24 = vadd.f32 %v2488_v28, %v1020_v21 }
 0x15e   : > { %v1022_v25 = vpop.f32.mrf.mxu0  ;;  %v1335_v26 = vpop.f32.mrf.mxu1 }
 0x15f   : > { %1736 = vst.msk [vmem:[%s2501_s13 + $0x2b0] sm:$0xff] %vm1649_vm1, %v1610_v23  ;;  %v1548_v27 = vmax.f32 %v1021_v24, 0.0  ;;  %v1336_v29 = vadd.f32 %v2488_v28, %v1335_v26 }
 0x160   : > { %v1025_v30 = vpop.f32.mrf.mxu0  ;;  %v1337_v31 = vpop.f32.mrf.mxu1 }
 0x161   : > { %1674 = vst.msk [vmem:[%s2501_s13 + $0xc0] sm:$0xff] %vm1649_vm1, %v1548_v27  ;;  %v1611_v32 = vmax.f32 %v1336_v29, 0.0  ;;  %v1026_v33 = vadd.f32 %v2488_v28, %v1025_v30 }
 0x162   : > { %v1027_v34 = vpop.f32.mrf.mxu0  ;;  %v1340_v35 = vpop.f32.mrf.mxu1 }
 0x163   : > { %1737 = vst.msk [vmem:[%s2501_s13 + $0x2b8] sm:$0xff] %vm1649_vm1, %v1611_v32  ;;  %v1549_v36 = vmax.f32 %v1026_v33, 0.0  ;;  %v1341_v37 = vadd.f32 %v2488_v28, %v1340_v35 }
 0x164   : > { %v1030_v38 = vpop.f32.mrf.mxu0  ;;  %v1342_v39 = vpop.f32.mrf.mxu1 }
 0x165   : > { %1675 = vst.msk [vmem:[%s2501_s13 + $0xc8] sm:$0xff] %vm1649_vm1, %v1549_v36  ;;  %v1612_v40 = vmax.f32 %v1341_v37, 0.0  ;;  %v1031_v41 = vadd.f32 %v2488_v28, %v1030_v38 }
 0x166   : > { %v1032_v42 = vpop.f32.mrf.mxu0  ;;  %v1345_v43 = vpop.f32.mrf.mxu1 }
 0x167   : > { %1738 = vst.msk [vmem:[%s2501_s13 + $0x2c0] sm:$0xff] %vm1649_vm1, %v1612_v40  ;;  %v1550_v44 = vmax.f32 %v1031_v41, 0.0  ;;  %v1346_v45 = vadd.f32 %v2488_v28, %v1345_v43 }
 0x168   : > { %v1035_v46 = vpop.f32.mrf.mxu0  ;;  %v1347_v47 = vpop.f32.mrf.mxu1 }
 0x169   : > { %1676 = vst.msk [vmem:[%s2501_s13 + $0xd0] sm:$0xff] %vm1649_vm1, %v1550_v44  ;;  %v1613_v48 = vmax.f32 %v1346_v45, 0.0  ;;  %v1036_v49 = vadd.f32 %v2488_v28, %v1035_v46 }
 0x16a   : > { %v1037_v50 = vpop.f32.mrf.mxu0  ;;  %v1350_v51 = vpop.f32.mrf.mxu1 }
 0x16b   : > { %1739 = vst.msk [vmem:[%s2501_s13 + $0x2c8] sm:$0xff] %vm1649_vm1, %v1613_v48  ;;  %v1551_v52 = vmax.f32 %v1036_v49, 0.0  ;;  %v1351_v53 = vadd.f32 %v2488_v28, %v1350_v51 }
 0x16c   : > { %v1040_v54 = vpop.f32.mrf.mxu0  ;;  %v1352_v55 = vpop.f32.mrf.mxu1 }
 0x16d   : > { %1677 = vst.msk [vmem:[%s2501_s13 + $0xd8] sm:$0xff] %vm1649_vm1, %v1551_v52  ;;  %v1614_v56 = vmax.f32 %v1351_v53, 0.0  ;;  %v1041_v57 = vadd.f32 %v2488_v28, %v1040_v54 }
 0x16e   : > { %v1042_v58 = vpop.f32.mrf.mxu0  ;;  %v1355_v59 = vpop.f32.mrf.mxu1 }
 0x16f   : > { %1740 = vst.msk [vmem:[%s2501_s13 + $0x2d0] sm:$0xff] %vm1649_vm1, %v1614_v56  ;;  %v1552_v60 = vmax.f32 %v1041_v57, 0.0  ;;  %v1356_v61 = vadd.f32 %v2488_v28, %v1355_v59 }
 0x170   : > { %v1045_v62 = vpop.f32.mrf.mxu0  ;;  %v1357_v63 = vpop.f32.mrf.mxu1 }
 0x171   : > { %1678 = vst.msk [vmem:[%s2501_s13 + $0xe0] sm:$0xff] %vm1649_vm1, %v1552_v60  ;;  %v1615_v0 = vmax.f32 %v1356_v61, 0.0  ;;  %v1046_v1 = vadd.f32 %v2488_v28, %v1045_v62 }
 0x172   : > { %v1047_v2 = vpop.f32.mrf.mxu0  ;;  %v1360_v3 = vpop.f32.mrf.mxu1 }
 0x173   : > { %1741 = vst.msk [vmem:[%s2501_s13 + $0x2d8] sm:$0xff] %vm1649_vm1, %v1615_v0  ;;  %v1553_v4 = vmax.f32 %v1046_v1, 0.0  ;;  %v1361_v5 = vadd.f32 %v2488_v28, %v1360_v3 }
 0x174   : > { %v1050_v6 = vpop.f32.mrf.mxu0  ;;  %v1362_v7 = vpop.f32.mrf.mxu1 }
 0x175   : > { %1679 = vst.msk [vmem:[%s2501_s13 + $0xe8] sm:$0xff] %vm1649_vm1, %v1553_v4  ;;  %v1616_v8 = vmax.f32 %v1361_v5, 0.0  ;;  %v1051_v9 = vadd.f32 %v2488_v28, %v1050_v6 }
 0x176   : > { %v1052_v10 = vpop.f32.mrf.mxu0  ;;  %v1365_v11 = vpop.f32.mrf.mxu1 }
 0x177   : > { %1742 = vst.msk [vmem:[%s2501_s13 + $0x2e0] sm:$0xff] %vm1649_vm1, %v1616_v8  ;;  %v1554_v12 = vmax.f32 %v1051_v9, 0.0  ;;  %v1366_v13 = vadd.f32 %v2488_v28, %v1365_v11 }
 0x178   : > { %v1055_v14 = vpop.f32.mrf.mxu0  ;;  %v1367_v15 = vpop.f32.mrf.mxu1 }
 0x179   : > { %1680 = vst.msk [vmem:[%s2501_s13 + $0xf0] sm:$0xff] %vm1649_vm1, %v1554_v12  ;;  %v1617_v16 = vmax.f32 %v1366_v13, 0.0  ;;  %v1056_v17 = vadd.f32 %v2488_v28, %v1055_v14 }
 0x17a   : > { %v1057_v18 = vpop.f32.mrf.mxu0  ;;  %v1370_v19 = vpop.f32.mrf.mxu1 }
 0x17b   : > { %1743 = vst.msk [vmem:[%s2501_s13 + $0x2e8] sm:$0xff] %vm1649_vm1, %v1617_v16  ;;  %v1555_v20 = vmax.f32 %v1056_v17, 0.0  ;;  %v1371_v21 = vadd.f32 %v2488_v28, %v1370_v19 }
 0x17c   : > { %v1060_v22 = vpop.f32.mrf.mxu0  ;;  %v1372_v23 = vpop.f32.mrf.mxu1 }
 0x17d   : > { %1681 = vst.msk [vmem:[%s2501_s13 + $0xf8] sm:$0xff] %vm1649_vm1, %v1555_v20  ;;  %v1618_v24 = vmax.f32 %v1371_v21, 0.0  ;;  %v1061_v25 = vadd.f32 %v2488_v28, %v1060_v22 }
 0x17e   : > { %v1062_v26 = vpop.f32.mrf.mxu0  ;;  %v1375_v27 = vpop.f32.mrf.mxu1 }
 0x17f   : > { %1744 = vst.msk [vmem:[%s2501_s13 + $0x2f0] sm:$0xff] %vm1649_vm1, %v1618_v24  ;;  %v1556_v29 = vmax.f32 %v1061_v25, 0.0  ;;  %v1376_v30 = vadd.f32 %v2488_v28, %v1375_v27  ;;  %v2820_v26 = vld [vmem:[%s2964_s2] ss:$0 sm:$0xff] }
 0x180   : > { %v1065_v31 = vpop.f32.mrf.mxu0  ;;  %v1377_v32 = vpop.f32.mrf.mxu1 }
 0x181   : > { %1682 = vst.msk [vmem:[%s2501_s13 + $0x100] sm:$0xff] %vm1649_vm1, %v1556_v29  ;;  %v1619_v33 = vmax.f32 %v1376_v30, 0.0  ;;  %v1066_v34 = vadd.f32 %v2488_v28, %v1065_v31 }
 0x182   : > { %v1067_v35 = vpop.f32.mrf.mxu0  ;;  %v1380_v36 = vpop.f32.mrf.mxu1 }
 0x183   : > { %1745 = vst.msk [vmem:[%s2501_s13 + $0x2f8] sm:$0xff] %vm1649_vm1, %v1619_v33  ;;  %v1557_v37 = vmax.f32 %v1066_v34, 0.0  ;;  %v1381_v38 = vadd.f32 %v2488_v28, %v1380_v36 }
 0x184   : > { %v1070_v39 = vpop.f32.mrf.mxu0  ;;  %v1382_v40 = vpop.f32.mrf.mxu1 }
 0x185   : > { %1683 = vst.msk [vmem:[%s2501_s13 + $0x108] sm:$0xff] %vm1649_vm1, %v1557_v37  ;;  %v1620_v41 = vmax.f32 %v1381_v38, 0.0  ;;  %v1071_v42 = vadd.f32 %v2488_v28, %v1070_v39 }
 0x186   : > { %v1072_v43 = vpop.f32.mrf.mxu0  ;;  %v1385_v44 = vpop.f32.mrf.mxu1 }
 0x187   : > { %1746 = vst.msk [vmem:[%s2501_s13 + $0x300] sm:$0xff] %vm1649_vm1, %v1620_v41  ;;  %v1558_v45 = vmax.f32 %v1071_v42, 0.0  ;;  %v1386_v46 = vadd.f32 %v2488_v28, %v1385_v44 }
 0x188   : > { %v1075_v47 = vpop.f32.mrf.mxu0  ;;  %v1387_v48 = vpop.f32.mrf.mxu1 }
 0x189   : > { %1684 = vst.msk [vmem:[%s2501_s13 + $0x110] sm:$0xff] %vm1649_vm1, %v1558_v45  ;;  %v1621_v49 = vmax.f32 %v1386_v46, 0.0  ;;  %v1076_v50 = vadd.f32 %v2488_v28, %v1075_v47 }
 0x18a   : > { %v1077_v51 = vpop.f32.mrf.mxu0  ;;  %v1390_v52 = vpop.f32.mrf.mxu1 }
 0x18b   : > { %1747 = vst.msk [vmem:[%s2501_s13 + $0x308] sm:$0xff] %vm1649_vm1, %v1621_v49  ;;  %v1559_v53 = vmax.f32 %v1076_v50, 0.0  ;;  %v1391_v54 = vadd.f32 %v2488_v28, %v1390_v52 }
 0x18c   : > { %v1080_v55 = vpop.f32.mrf.mxu0  ;;  %v1392_v56 = vpop.f32.mrf.mxu1 }
 0x18d   : > { %1685 = vst.msk [vmem:[%s2501_s13 + $0x118] sm:$0xff] %vm1649_vm1, %v1559_v53  ;;  %v1622_v57 = vmax.f32 %v1391_v54, 0.0  ;;  %v1081_v58 = vadd.f32 %v2488_v28, %v1080_v55 }
 0x18e   : > { %v1082_v59 = vpop.f32.mrf.mxu0  ;;  %v1395_v60 = vpop.f32.mrf.mxu1 }
 0x18f   : > { %1748 = vst.msk [vmem:[%s2501_s13 + $0x310] sm:$0xff] %vm1649_vm1, %v1622_v57  ;;  %v1560_v61 = vmax.f32 %v1081_v58, 0.0  ;;  %v1396_v62 = vadd.f32 %v2488_v28, %v1395_v60 }
 0x190   : > { %v1085_v63 = vpop.f32.mrf.mxu0  ;;  %v1397_v0 = vpop.f32.mrf.mxu1 }
 0x191   : > { %1686 = vst.msk [vmem:[%s2501_s13 + $0x120] sm:$0xff] %vm1649_vm1, %v1560_v61  ;;  %v1623_v1 = vmax.f32 %v1396_v62, 0.0  ;;  %v1086_v2 = vadd.f32 %v2488_v28, %v1085_v63 }
 0x192   : > { %v1087_v3 = vpop.f32.mrf.mxu0  ;;  %v1400_v4 = vpop.f32.mrf.mxu1 }
 0x193   : > { %1749 = vst.msk [vmem:[%s2501_s13 + $0x318] sm:$0xff] %vm1649_vm1, %v1623_v1  ;;  %v1561_v5 = vmax.f32 %v1086_v2, 0.0  ;;  %v1401_v6 = vadd.f32 %v2488_v28, %v1400_v4 }
 0x194   : > { %v1090_v7 = vpop.f32.mrf.mxu0  ;;  %v1402_v8 = vpop.f32.mrf.mxu1 }
 0x195   : > { %1687 = vst.msk [vmem:[%s2501_s13 + $0x128] sm:$0xff] %vm1649_vm1, %v1561_v5  ;;  %v1624_v9 = vmax.f32 %v1401_v6, 0.0  ;;  %v1091_v10 = vadd.f32 %v2488_v28, %v1090_v7 }
 0x196   : > { %v1092_v11 = vpop.f32.mrf.mxu0  ;;  %v1405_v12 = vpop.f32.mrf.mxu1 }
 0x197   : > { %1750 = vst.msk [vmem:[%s2501_s13 + $0x320] sm:$0xff] %vm1649_vm1, %v1624_v9  ;;  %v1562_v13 = vmax.f32 %v1091_v10, 0.0  ;;  %v1406_v14 = vadd.f32 %v2488_v28, %v1405_v12 }
 0x198   : > { %v1095_v15 = vpop.f32.mrf.mxu0  ;;  %v1407_v16 = vpop.f32.mrf.mxu1 }
 0x199   : > { %1688 = vst.msk [vmem:[%s2501_s13 + $0x130] sm:$0xff] %vm1649_vm1, %v1562_v13  ;;  %v1625_v17 = vmax.f32 %v1406_v14, 0.0  ;;  %v1096_v18 = vadd.f32 %v2488_v28, %v1095_v15 }
 0x19a   : > { %v1097_v19 = vpop.f32.mrf.mxu0  ;;  %v1410_v20 = vpop.f32.mrf.mxu1 }
 0x19b   : > { %1751 = vst.msk [vmem:[%s2501_s13 + $0x328] sm:$0xff] %vm1649_vm1, %v1625_v17  ;;  %v1563_v21 = vmax.f32 %v1096_v18, 0.0  ;;  %v1411_v22 = vadd.f32 %v2488_v28, %v1410_v20 }
 0x19c   : > { %v1100_v23 = vpop.f32.mrf.mxu0  ;;  %v1412_v24 = vpop.f32.mrf.mxu1 }
 0x19d   : > { %1689 = vst.msk [vmem:[%s2501_s13 + $0x138] sm:$0xff] %vm1649_vm1, %v1563_v21  ;;  %v1626_v25 = vmax.f32 %v1411_v22, 0.0  ;;  %v1101_v27 = vadd.f32 %v2820_v26, %v1100_v23 }
 0x19e   : > { %v1102_v29 = vpop.f32.mrf.mxu0  ;;  %v1415_v30 = vpop.f32.mrf.mxu1 }
 0x19f   : > { %1752 = vst.msk [vmem:[%s2501_s13 + $0x330] sm:$0xff] %vm1649_vm1, %v1626_v25  ;;  %v1564_v31 = vmax.f32 %v1101_v27, 0.0  ;;  %v1416_v28 = vadd.f32 %v2820_v26, %v1415_v30 }
 0x1a0   : > { %v1105_v32 = vpop.f32.mrf.mxu0  ;;  %v1417_v33 = vpop.f32.mrf.mxu1 }
 0x1a1   : > { %1690 = vst.msk [vmem:[%s2501_s13 + $0x140] sm:$0xff] %vm1649_vm1, %v1564_v31  ;;  %v1627_v34 = vmax.f32 %v1416_v28, 0.0  ;;  %v1106_v35 = vadd.f32 %v2820_v26, %v1105_v32 }
 0x1a2   : > { %v1107_v36 = vpop.f32.mrf.mxu0  ;;  %v1420_v37 = vpop.f32.mrf.mxu1 }
 0x1a3   : > { %1753 = vst.msk [vmem:[%s2501_s13 + $0x338] sm:$0xff] %vm1649_vm1, %v1627_v34  ;;  %v1565_v38 = vmax.f32 %v1106_v35, 0.0  ;;  %v1421_v39 = vadd.f32 %v2820_v26, %v1420_v37 }
 0x1a4   : > { %v1110_v40 = vpop.f32.mrf.mxu0  ;;  %v1422_v41 = vpop.f32.mrf.mxu1 }
 0x1a5   : > { %1691 = vst.msk [vmem:[%s2501_s13 + $0x148] sm:$0xff] %vm1649_vm1, %v1565_v38  ;;  %v1628_v42 = vmax.f32 %v1421_v39, 0.0  ;;  %v1111_v43 = vadd.f32 %v2820_v26, %v1110_v40 }
 0x1a6   : > { %v1112_v44 = vpop.f32.mrf.mxu0  ;;  %v1425_v45 = vpop.f32.mrf.mxu1 }
 0x1a7   : > { %1754 = vst.msk [vmem:[%s2501_s13 + $0x340] sm:$0xff] %vm1649_vm1, %v1628_v42  ;;  %v1566_v46 = vmax.f32 %v1111_v43, 0.0  ;;  %v1426_v47 = vadd.f32 %v2820_v26, %v1425_v45 }
 0x1a8   : > { %v1115_v48 = vpop.f32.mrf.mxu0  ;;  %v1427_v49 = vpop.f32.mrf.mxu1 }
 0x1a9   : > { %1692 = vst.msk [vmem:[%s2501_s13 + $0x150] sm:$0xff] %vm1649_vm1, %v1566_v46  ;;  %v1629_v50 = vmax.f32 %v1426_v47, 0.0  ;;  %v1116_v51 = vadd.f32 %v2820_v26, %v1115_v48 }
 0x1aa   : > { %v1117_v52 = vpop.f32.mrf.mxu0  ;;  %v1430_v53 = vpop.f32.mrf.mxu1 }
 0x1ab   : > { %1755 = vst.msk [vmem:[%s2501_s13 + $0x348] sm:$0xff] %vm1649_vm1, %v1629_v50  ;;  %v1567_v54 = vmax.f32 %v1116_v51, 0.0  ;;  %v1431_v55 = vadd.f32 %v2820_v26, %v1430_v53 }
 0x1ac   : > { %v1120_v56 = vpop.f32.mrf.mxu0  ;;  %v1432_v57 = vpop.f32.mrf.mxu1 }
 0x1ad   : > { %1693 = vst.msk [vmem:[%s2501_s13 + $0x158] sm:$0xff] %vm1649_vm1, %v1567_v54  ;;  %v1630_v58 = vmax.f32 %v1431_v55, 0.0  ;;  %v1121_v59 = vadd.f32 %v2820_v26, %v1120_v56 }
 0x1ae   : > { %v1122_v60 = vpop.f32.mrf.mxu0  ;;  %v1435_v61 = vpop.f32.mrf.mxu1 }
 0x1af   : > { %1756 = vst.msk [vmem:[%s2501_s13 + $0x350] sm:$0xff] %vm1649_vm1, %v1630_v58  ;;  %v1568_v62 = vmax.f32 %v1121_v59, 0.0  ;;  %v1436_v63 = vadd.f32 %v2820_v26, %v1435_v61 }
 0x1b0   : > { %v1125_v0 = vpop.f32.mrf.mxu0  ;;  %v1437_v1 = vpop.f32.mrf.mxu1 }
 0x1b1   : > { %1694 = vst.msk [vmem:[%s2501_s13 + $0x160] sm:$0xff] %vm1649_vm1, %v1568_v62  ;;  %v1631_v2 = vmax.f32 %v1436_v63, 0.0  ;;  %v1126_v3 = vadd.f32 %v2820_v26, %v1125_v0 }
 0x1b2   : > { %v1127_v4 = vpop.f32.mrf.mxu0  ;;  %v1440_v5 = vpop.f32.mrf.mxu1 }
 0x1b3   : > { %1757 = vst.msk [vmem:[%s2501_s13 + $0x358] sm:$0xff] %vm1649_vm1, %v1631_v2  ;;  %v1569_v6 = vmax.f32 %v1126_v3, 0.0  ;;  %v1441_v7 = vadd.f32 %v2820_v26, %v1440_v5 }
 0x1b4   : > { %v1130_v8 = vpop.f32.mrf.mxu0  ;;  %v1442_v9 = vpop.f32.mrf.mxu1 }
 0x1b5   : > { %1695 = vst.msk [vmem:[%s2501_s13 + $0x168] sm:$0xff] %vm1649_vm1, %v1569_v6  ;;  %v1632_v10 = vmax.f32 %v1441_v7, 0.0  ;;  %v1131_v11 = vadd.f32 %v2820_v26, %v1130_v8 }
 0x1b6   : > { %v1132_v12 = vpop.f32.mrf.mxu0  ;;  %v1445_v13 = vpop.f32.mrf.mxu1 }
 0x1b7   : > { %1758 = vst.msk [vmem:[%s2501_s13 + $0x360] sm:$0xff] %vm1649_vm1, %v1632_v10  ;;  %v1570_v14 = vmax.f32 %v1131_v11, 0.0  ;;  %v1446_v15 = vadd.f32 %v2820_v26, %v1445_v13 }
 0x1b8   : > { %v1135_v16 = vpop.f32.mrf.mxu0  ;;  %v1447_v17 = vpop.f32.mrf.mxu1 }
 0x1b9   : > { %1696 = vst.msk [vmem:[%s2501_s13 + $0x170] sm:$0xff] %vm1649_vm1, %v1570_v14  ;;  %v1633_v18 = vmax.f32 %v1446_v15, 0.0  ;;  %v1136_v19 = vadd.f32 %v2820_v26, %v1135_v16 }
 0x1ba   : > { %v1137_v20 = vpop.f32.mrf.mxu0  ;;  %v1450_v21 = vpop.f32.mrf.mxu1 }
 0x1bb   : > { %1759 = vst.msk [vmem:[%s2501_s13 + $0x368] sm:$0xff] %vm1649_vm1, %v1633_v18  ;;  %v1571_v22 = vmax.f32 %v1136_v19, 0.0  ;;  %v1451_v23 = vadd.f32 %v2820_v26, %v1450_v21 }
 0x1bc   : > { %v1140_v24 = vpop.f32.mrf.mxu0  ;;  %v1452_v25 = vpop.f32.mrf.mxu1 }
 0x1bd   : > { %1697 = vst.msk [vmem:[%s2501_s13 + $0x178] sm:$0xff] %vm1649_vm1, %v1571_v22  ;;  %v1634_v27 = vmax.f32 %v1451_v23, 0.0  ;;  %v1141_v29 = vadd.f32 %v2820_v26, %v1140_v24 }
 0x1be   : > { %v1142_v30 = vpop.f32.mrf.mxu0  ;;  %v1455_v31 = vpop.f32.mrf.mxu1 }
 0x1bf   : > { %1760 = vst.msk [vmem:[%s2501_s13 + $0x370] sm:$0xff] %vm1649_vm1, %v1634_v27  ;;  %v1572_v28 = vmax.f32 %v1141_v29, 0.0  ;;  %v1456_v32 = vadd.f32 %v2820_v26, %v1455_v31 }
 0x1c0   : > { %v1145_v33 = vpop.f32.mrf.mxu0  ;;  %v1457_v34 = vpop.f32.mrf.mxu1 }
 0x1c1   : > { %1698 = vst.msk [vmem:[%s2501_s13 + $0x180] sm:$0xff] %vm1649_vm1, %v1572_v28  ;;  %v1635_v35 = vmax.f32 %v1456_v32, 0.0  ;;  %v1146_v36 = vadd.f32 %v2820_v26, %v1145_v33 }
 0x1c2   : > { %v1147_v37 = vpop.f32.mrf.mxu0  ;;  %v1460_v38 = vpop.f32.mrf.mxu1 }
 0x1c3   : > { %1761 = vst.msk [vmem:[%s2501_s13 + $0x378] sm:$0xff] %vm1649_vm1, %v1635_v35  ;;  %v1573_v39 = vmax.f32 %v1146_v36, 0.0  ;;  %v1461_v40 = vadd.f32 %v2820_v26, %v1460_v38 }
 0x1c4   : > { %v1150_v41 = vpop.f32.mrf.mxu0  ;;  %v1462_v42 = vpop.f32.mrf.mxu1 }
 0x1c5   : > { %1699 = vst.msk [vmem:[%s2501_s13 + $0x188] sm:$0xff] %vm1649_vm1, %v1573_v39  ;;  %v1636_v43 = vmax.f32 %v1461_v40, 0.0  ;;  %v1151_v44 = vadd.f32 %v2820_v26, %v1150_v41 }
 0x1c6   : > { %v1152_v45 = vpop.f32.mrf.mxu0  ;;  %v1465_v46 = vpop.f32.mrf.mxu1 }
 0x1c7   : > { %1762 = vst.msk [vmem:[%s2501_s13 + $0x380] sm:$0xff] %vm1649_vm1, %v1636_v43  ;;  %v1574_v47 = vmax.f32 %v1151_v44, 0.0  ;;  %v1466_v48 = vadd.f32 %v2820_v26, %v1465_v46 }
 0x1c8   : > { %v1155_v49 = vpop.f32.mrf.mxu0  ;;  %v1467_v50 = vpop.f32.mrf.mxu1 }
 0x1c9   : > { %1700 = vst.msk [vmem:[%s2501_s13 + $0x190] sm:$0xff] %vm1649_vm1, %v1574_v47  ;;  %v1637_v51 = vmax.f32 %v1466_v48, 0.0  ;;  %v1156_v52 = vadd.f32 %v2820_v26, %v1155_v49 }
 0x1ca   : > { %v1157_v53 = vpop.f32.mrf.mxu0  ;;  %v1470_v54 = vpop.f32.mrf.mxu1 }
 0x1cb   : > { %1763 = vst.msk [vmem:[%s2501_s13 + $0x388] sm:$0xff] %vm1649_vm1, %v1637_v51  ;;  %v1575_v55 = vmax.f32 %v1156_v52, 0.0  ;;  %v1471_v56 = vadd.f32 %v2820_v26, %v1470_v54 }
 0x1cc   : > { %v1160_v57 = vpop.f32.mrf.mxu0  ;;  %v1472_v58 = vpop.f32.mrf.mxu1 }
 0x1cd   : > { %1701 = vst.msk [vmem:[%s2501_s13 + $0x198] sm:$0xff] %vm1649_vm1, %v1575_v55  ;;  %v1638_v59 = vmax.f32 %v1471_v56, 0.0  ;;  %v1161_v60 = vadd.f32 %v2820_v26, %v1160_v57 }
 0x1ce   : > { %v1162_v61 = vpop.f32.mrf.mxu0  ;;  %v1475_v62 = vpop.f32.mrf.mxu1 }
 0x1cf   : > { %1764 = vst.msk [vmem:[%s2501_s13 + $0x390] sm:$0xff] %vm1649_vm1, %v1638_v59  ;;  %v1576_v63 = vmax.f32 %v1161_v60, 0.0  ;;  %v1476_v0 = vadd.f32 %v2820_v26, %v1475_v62 }
 0x1d0   : > { %v1165_v1 = vpop.f32.mrf.mxu0  ;;  %v1477_v2 = vpop.f32.mrf.mxu1 }
 0x1d1   : > { %1702 = vst.msk [vmem:[%s2501_s13 + $0x1a0] sm:$0xff] %vm1649_vm1, %v1576_v63  ;;  %v1639_v3 = vmax.f32 %v1476_v0, 0.0  ;;  %v1166_v4 = vadd.f32 %v2820_v26, %v1165_v1 }
 0x1d2   : > { %v1167_v5 = vpop.f32.mrf.mxu0  ;;  %v1480_v6 = vpop.f32.mrf.mxu1 }
 0x1d3   : > { %1765 = vst.msk [vmem:[%s2501_s13 + $0x398] sm:$0xff] %vm1649_vm1, %v1639_v3  ;;  %v1577_v7 = vmax.f32 %v1166_v4, 0.0  ;;  %v1481_v8 = vadd.f32 %v2820_v26, %v1480_v6 }
 0x1d4   : > { %v1170_v9 = vpop.f32.mrf.mxu0  ;;  %v1482_v10 = vpop.f32.mrf.mxu1 }
 0x1d5   : > { %1703 = vst.msk [vmem:[%s2501_s13 + $0x1a8] sm:$0xff] %vm1649_vm1, %v1577_v7  ;;  %v1640_v11 = vmax.f32 %v1481_v8, 0.0  ;;  %v1171_v12 = vadd.f32 %v2820_v26, %v1170_v9 }
 0x1d6   : > { %v1172_v13 = vpop.f32.mrf.mxu0  ;;  %v1485_v14 = vpop.f32.mrf.mxu1 }
 0x1d7   : > { %1766 = vst.msk [vmem:[%s2501_s13 + $0x3a0] sm:$0xff] %vm1649_vm1, %v1640_v11  ;;  %v1578_v15 = vmax.f32 %v1171_v12, 0.0  ;;  %v1486_v16 = vadd.f32 %v2820_v26, %v1485_v14 }
 0x1d8   : > { %v1175_v17 = vpop.f32.mrf.mxu0  ;;  %v1487_v18 = vpop.f32.mrf.mxu1 }
 0x1d9   : > { %1704 = vst.msk [vmem:[%s2501_s13 + $0x1b0] sm:$0xff] %vm1649_vm1, %v1578_v15  ;;  %v1641_v19 = vmax.f32 %v1486_v16, 0.0  ;;  %v1176_v20 = vadd.f32 %v2820_v26, %v1175_v17 }
 0x1da   : > { %v1177_v21 = vpop.f32.mrf.mxu0  ;;  %v1490_v22 = vpop.f32.mrf.mxu1 }
 0x1db   : > { %1767 = vst.msk [vmem:[%s2501_s13 + $0x3a8] sm:$0xff] %vm1649_vm1, %v1641_v19  ;;  %v1579_v23 = vmax.f32 %v1176_v20, 0.0  ;;  %v1491_v24 = vadd.f32 %v2820_v26, %v1490_v22 }
 0x1dc   : > { %v1180_v25 = vpop.f32.mrf.mxu0  ;;  %v1492_v27 = vpop.f32.mrf.mxu1 }
 0x1dd   : > { %1705 = vst.msk [vmem:[%s2501_s13 + $0x1b8] sm:$0xff] %vm1649_vm1, %v1579_v23  ;;  %v1642_v29 = vmax.f32 %v1491_v24, 0.0  ;;  %v1181_v30 = vadd.f32 %v2820_v26, %v1180_v25 }
 0x1de   : > { %v1182_v31 = vpop.f32.mrf.mxu0  ;;  %v1495_v28 = vpop.f32.mrf.mxu1 }
 0x1df   : > { %1768 = vst.msk [vmem:[%s2501_s13 + $0x3b0] sm:$0xff] %vm1649_vm1, %v1642_v29  ;;  %v1580_v32 = vmax.f32 %v1181_v30, 0.0  ;;  %v1496_v33 = vadd.f32 %v2820_v26, %v1495_v28 }
 0x1e0   : > { %v1185_v34 = vpop.f32.mrf.mxu0  ;;  %v1497_v35 = vpop.f32.mrf.mxu1 }
 0x1e1   : > { %1706 = vst.msk [vmem:[%s2501_s13 + $0x1c0] sm:$0xff] %vm1649_vm1, %v1580_v32  ;;  %v1643_v36 = vmax.f32 %v1496_v33, 0.0  ;;  %v1186_v37 = vadd.f32 %v2820_v26, %v1185_v34 }
 0x1e2   : > { %v1187_v38 = vpop.f32.mrf.mxu0  ;;  %v1500_v39 = vpop.f32.mrf.mxu1 }
 0x1e3   : > { %1769 = vst.msk [vmem:[%s2501_s13 + $0x3b8] sm:$0xff] %vm1649_vm1, %v1643_v36  ;;  %v1581_v40 = vmax.f32 %v1186_v37, 0.0  ;;  %v1501_v41 = vadd.f32 %v2820_v26, %v1500_v39 }
 0x1e4   : > { %v1190_v42 = vpop.f32.mrf.mxu0  ;;  %v1502_v43 = vpop.f32.mrf.mxu1 }
 0x1e5   : > { %1707 = vst.msk [vmem:[%s2501_s13 + $0x1c8] sm:$0xff] %vm1649_vm1, %v1581_v40  ;;  %v1644_v44 = vmax.f32 %v1501_v41, 0.0  ;;  %v1191_v45 = vadd.f32 %v2820_v26, %v1190_v42 }
 0x1e6   : > { %v1192_v46 = vpop.f32.mrf.mxu0  ;;  %v1505_v47 = vpop.f32.mrf.mxu1 }
 0x1e7   : > { %1770 = vst.msk [vmem:[%s2501_s13 + $0x3c0] sm:$0xff] %vm1649_vm1, %v1644_v44  ;;  %v1582_v48 = vmax.f32 %v1191_v45, 0.0  ;;  %v1506_v49 = vadd.f32 %v2820_v26, %v1505_v47 }
 0x1e8   : > { %v1195_v50 = vpop.f32.mrf.mxu0  ;;  %v1507_v51 = vpop.f32.mrf.mxu1 }
 0x1e9   : > { %1708 = vst.msk [vmem:[%s2501_s13 + $0x1d0] sm:$0xff] %vm1649_vm1, %v1582_v48  ;;  %v1645_v52 = vmax.f32 %v1506_v49, 0.0  ;;  %v1196_v53 = vadd.f32 %v2820_v26, %v1195_v50 }
 0x1ea   : > { %v1197_v54 = vpop.f32.mrf.mxu0  ;;  %v1510_v55 = vpop.f32.mrf.mxu1 }
 0x1eb   : > { %1771 = vst.msk [vmem:[%s2501_s13 + $0x3c8] sm:$0xff] %vm1649_vm1, %v1645_v52  ;;  %v1583_v56 = vmax.f32 %v1196_v53, 0.0  ;;  %v1511_v57 = vadd.f32 %v2820_v26, %v1510_v55 }
 0x1ec   : > { %v1200_v58 = vpop.f32.mrf.mxu0  ;;  %v1512_v59 = vpop.f32.mrf.mxu1 }
 0x1ed   : > { %1709 = vst.msk [vmem:[%s2501_s13 + $0x1d8] sm:$0xff] %vm1649_vm1, %v1583_v56  ;;  %v1646_v60 = vmax.f32 %v1511_v57, 0.0  ;;  %v1201_v61 = vadd.f32 %v2820_v26, %v1200_v58 }
 0x1ee   : > { %v1202_v62 = vpop.f32.mrf.mxu0  ;;  %v1515_v63 = vpop.f32.mrf.mxu1 }
 0x1ef   : > { %1772 = vst.msk [vmem:[%s2501_s13 + $0x3d0] sm:$0xff] %vm1649_vm1, %v1646_v60  ;;  %v1584_v0 = vmax.f32 %v1201_v61, 0.0  ;;  %v1516_v1 = vadd.f32 %v2820_v26, %v1515_v63 }
 0x1f0   : > { %v1205_v2 = vpop.f32.mrf.mxu0  ;;  %v1517_v3 = vpop.f32.mrf.mxu1 }
 0x1f1   : > { %1710 = vst.msk [vmem:[%s2501_s13 + $0x1e0] sm:$0xff] %vm1649_vm1, %v1584_v0  ;;  %v1647_v4 = vmax.f32 %v1516_v1, 0.0  ;;  %v1206_v5 = vadd.f32 %v2820_v26, %v1205_v2 }
 0x1f2   : > { %v1207_v6 = vpop.f32.mrf.mxu0  ;;  %v1520_v7 = vpop.f32.mrf.mxu1 }
 0x1f3   : > { %1773 = vst.msk [vmem:[%s2501_s13 + $0x3d8] sm:$0xff] %vm1649_vm1, %v1647_v4  ;;  %v1585_v8 = vmax.f32 %v1206_v5, 0.0  ;;  %v1521_v9 = vadd.f32 %v2820_v26, %v1520_v7 }
 0x1f4   : > { %v1210_v10 = vpop.f32.mrf.mxu0  ;;  %v1522_v11 = vpop.f32.mrf.mxu1 }
 0x1f5   : > { %1711 = vst.msk [vmem:[%s2501_s13 + $0x1e8] sm:$0xff] %vm1649_vm1, %v1585_v8  ;;  %v1648_v12 = vmax.f32 %v1521_v9, 0.0  ;;  %v1211_v13 = vadd.f32 %v2820_v26, %v1210_v10 }
 0x1f6   : > { %v1212_v14 = vpop.f32.mrf.mxu0 }
 0x1f7   : > { %1774 = vst.msk [vmem:[%s2501_s13 + $0x3e0] sm:$0xff] %vm1649_vm1, %v1648_v12  ;;  %v1586_v15 = vmax.f32 %v1211_v13, 0.0 }
 0x1f9   : > { %1712 = vst.msk [vmem:[%s2501_s13 + $0x1f0] sm:$0xff] %vm1649_vm1, %v1586_v15 }
 0x1fa PF: > { %s13_s12 = sadd.s32 1, %s2032_s12  }
 0x1fb   : > { %p10_p4 = scmp.ge.s32.totalorder %s13_s12, 6  }
 0x1fd   :  { %12 = sbr.rel (!%p10_p4) target bundleno = 1 (0x1), region = 62 }

</bundles_post_ra>
